<compile_context>
chip_gen: v5e
topology: v5e:2x2
jax: 0.10.0
libtpu: 0.0.40
codegen_flags: <defaults>
</compile_context>

<pallas_src>
from math import floor

import numpy as np
import jax
import jax.numpy as jnp
from jax.experimental import pallas as pl
from jax.experimental.pallas import tpu as pltpu


def _stack2(row0, row1):
    """Stack two (1, n) rows into (2, n) via broadcast + iota-select."""
    n = row0.shape[-1]
    ridx = jax.lax.broadcasted_iota(jnp.int32, (2, n), 0)
    return jnp.where(ridx == 0,
                     jnp.broadcast_to(row0, (2, n)),
                     jnp.broadcast_to(row1, (2, n)))


def make_fused_kernel(inv_count, eps):
    """Single-block forward (whole batch resident): conv+relu+pool+BN+linear."""

    def kernel(x_ref, wconv_ref, bconv_ref, pool_ref, a0_ref,
               weff_ref, beff_ref, out_ref):
        # Conv1d (padding + im2col folded into wconv) + bias + ReLU.  (N, n1*Lc)
        y = jnp.dot(x_ref[...], wconv_ref[...],
                    preferred_element_type=jnp.float32) + bconv_ref[...]
        y = jnp.maximum(y, 0.0)

        # AvgPool1d as a block-diagonal matmul.                       (N, n1*Lb)
        p = jnp.dot(y.astype(jnp.bfloat16), pool_ref[...],
                    preferred_element_type=jnp.float32)

        # BatchNorm1d (training mode): per-channel mean and E[x^2] fused into
        # ONE small matmul against the segmented block-of-ones matrix a0.
        # TODO(synk): running_mean/running_var buffer updates are not modeled.
        stacked = _stack2(jnp.sum(p, axis=0, keepdims=True),
                          jnp.sum(p * p, axis=0, keepdims=True))       # (2, n1*Lb)
        moments = jnp.dot(stacked, a0_ref[...],
                          preferred_element_type=jnp.float32) * inv_count
        mean = moments[0:1, :]
        var = moments[1:2, :] - mean * mean
        invstd = jax.lax.rsqrt(var + eps)

        # Linear (gamma/beta folded into weff/beff).  The normalize is split as
        # (p*invstd)@W - (mean*invstd)@W so no (N, n2) xhat is materialized.
        main = jnp.dot((p * invstd).astype(jnp.bfloat16), weff_ref[...],
                       preferred_element_type=jnp.float32)             # (N, out_pad)
        corr = jnp.dot((mean * invstd).astype(jnp.bfloat16), weff_ref[...],
                       preferred_element_type=jnp.float32)             # (1, out_pad)
        out_ref[...] = (main + (beff_ref[...] - corr)).astype(out_ref.dtype)

    return kernel


def stats_kernel(x_ref, wconv_ref, bconv_ref, pool_ref, p_ref, psum_ref):
    """Pass 1 (tiled): conv+relu+pool for one batch tile; emit p (bf16) and the
    per-tile partial [sum, sum-of-squares] so tiles stay fully independent."""
    y = jnp.dot(x_ref[...], wconv_ref[...],
                preferred_element_type=jnp.float32) + bconv_ref[...]
    y = jnp.maximum(y, 0.0)
    p = jnp.dot(y.astype(jnp.bfloat16), pool_ref[...],
                preferred_element_type=jnp.float32)
    p_ref[...] = p.astype(p_ref.dtype)
    psum_ref[0] = _stack2(jnp.sum(p, axis=0, keepdims=True),
                          jnp.sum(p * p, axis=0, keepdims=True))


def linear_kernel(p_ref, w_ref, b_ref, out_ref):
    """Pass 2 (tiled): BN-normalize already folded into w/b -> plain matmul."""
    out_ref[...] = (jnp.dot(p_ref[...], w_ref[...],
                            preferred_element_type=jnp.float32)
                    + b_ref[...]).astype(out_ref.dtype)


class SequencePallas:
    """Pallas port of the PyTorch `Sequence` module (forward pass)."""

    def __init__(self, signal_length=129, hidden=64, predict_n=1, tile_n=128,
                 key=None):
        if key is None:
            key = jax.random.PRNGKey(0)
        self.channels = 2                         # len(Channel)
        self.kernel1, self.stride1, self.padding1 = 5, 3, 2
        self.kernel2, self.stride2 = 6, 4
        dilation1 = 1
        self.L_in = signal_length - predict_n
        self.n1 = floor(hidden / 500.0 * self.L_in)
        self.Lc = floor((self.L_in + 2 * self.padding1
                         - dilation1 * (self.kernel1 - 1) - 1) / self.stride1 + 1)
        self.Lb = floor((self.Lc - self.kernel2) / self.stride2 + 1)
        self.n2 = self.n1 * self.Lb
        self.out_dim = signal_length - 1
        self.out_pad = ((self.out_dim + 127) // 128) * 128   # lane-dense output
        self.eps = 1e-5
        self.tile_n = tile_n                                  # batch tile (VMEM-safe on v7x)
        self.CL = self.channels * self.L_in
        self.n1Lc = self.n1 * self.Lc

        k = jax.random.split(key, 4)
        self.conv_w = 0.1 * jax.random.normal(
            k[0], (self.n1, self.channels, self.kernel1), jnp.float32)
        self.conv_b = 0.1 * jax.random.normal(k[1], (self.n1,), jnp.float32)
        self.gamma = jnp.ones((self.n1,), jnp.float32)
        self.beta = jnp.zeros((self.n1,), jnp.float32)
        self.lin_w = 0.1 * jax.random.normal(k[2], (self.out_dim, self.n2), jnp.float32)
        self.lin_b = 0.1 * jax.random.normal(k[3], (self.out_dim,), jnp.float32)

        self._build_fused_params()
        self._forward = jax.jit(self._forward_impl)   # compiled once per input shape

    # ---------------------------------------------------------------- params
    def _build_fused_params(self):
        C, L, n1, Lc, Lb = self.channels, self.L_in, self.n1, self.Lc, self.Lb
        K1, s1, p1 = self.kernel1, self.stride1, self.padding1
        K2, s2 = self.kernel2, self.stride2

        # Conv1d folded into a (C*L_in, n1*Lc) matrix (pad taps dropped).
        w = np.asarray(self.conv_w)                                  # (n1, C, K1)
        t = np.arange(Lc)
        l = np.arange(L)
        k = l[None, :] - s1 * t[:, None] + p1                        # (Lc, L)
        valid = (k >= 0) & (k < K1)
        tap = w[:, :, np.clip(k, 0, K1 - 1)] * valid[None, None]     # (n1, C, Lc, L)
        wconv = tap.transpose(1, 3, 0, 2).reshape(C * L, n1 * Lc)    # row c*L+l, col n*Lc+t
        bconv = np.repeat(np.asarray(self.conv_b), Lc)[None, :]      # (1, n1*Lc)

        # AvgPool1d(kernel2, stride2) as a block-diagonal averaging matrix.
        b = np.arange(Lb)
        pm = ((t[:, None] >= s2 * b[None, :]) &
              (t[:, None] < s2 * b[None, :] + K2)).astype(np.float32) / float(K2)
        pool = np.kron(np.eye(n1, dtype=np.float32), pm)             # (n1*Lc, n1*Lb)

        # Per-channel segmented-sum matrix for BN stats (entries 0/1).
        a0 = np.kron(np.eye(n1, dtype=np.float32),
                     np.ones((Lb, Lb), dtype=np.float32))            # (n1*Lb, n1*Lb)

        # Linear with gamma/beta folded in; output zero-padded to a lane multiple.
        lw = np.asarray(self.lin_w)                                  # (out_dim, n2)
        gamma_r = np.repeat(np.asarray(self.gamma), Lb)
        beta_r = np.repeat(np.asarray(self.beta), Lb)
        weff = (lw * gamma_r[None, :]).T                             # (n2, out_dim)
        beff = np.asarray(self.lin_b) + lw @ beta_r
        pad = self.out_pad - self.out_dim
        if pad:
            weff = np.pad(weff, ((0, 0), (0, pad)))
            beff = np.pad(beff, (0, pad))

        # bf16 storage halves the weight DMA; dots accumulate in f32.
        self.wconv = jnp.asarray(wconv, jnp.bfloat16)
        self.bconv = jnp.asarray(bconv, jnp.float32)
        self.pool = jnp.asarray(pool, jnp.bfloat16)
        self.a0 = jnp.asarray(a0, jnp.bfloat16)                      # 0/1 -> exact in bf16
        self.weff_f32 = jnp.asarray(weff, jnp.float32)               # f32 copy for BN folding
        self.weff = self.weff_f32.astype(jnp.bfloat16)
        self.beff = jnp.asarray(beff, jnp.float32)[None, :]

    # --------------------------------------------------------------- forward
    def _forward_impl(self, x):
        N, C, L = x.shape
        x2 = x.reshape(N, C * L).astype(jnp.bfloat16)   # free reshape + bf16 stream
        if N > self.tile_n and N % self.tile_n == 0:
            out = self._forward_tiled(x2, N)
        else:
            # TODO(synk): N > tile_n that is not a multiple of tile_n falls back
            # to the single-block path (no partial-tile row masking implemented).
            out = self._forward_fused(x2, N)
        return out[:, :self.out_dim]

    def _forward_fused(self, x2, N):
        """Small-batch path: whole batch in one block, single fused kernel."""
        inv_count = 1.0 / float(N * self.Lb)
        kernel = make_fused_kernel(inv_count, self.eps)
        vmem = pl.BlockSpec(memory_space=pltpu.MemorySpace.VMEM)
        flops = (2 * N * (self.CL * self.n1Lc + self.n1Lc * self.n2
                          + self.n2 * self.out_pad)
                 + 4 * self.n2 * self.n2 + 2 * self.n2 * self.out_pad)
        nbytes = (x2.size * 2 + self.wconv.size * 2 + self.bconv.size * 4
                  + self.pool.size * 2 + self.a0.size * 2 + self.weff.size * 2
                  + self.beff.size * 4 + N * self.out_pad * 4)
        return pl.pallas_call(
            kernel,
            out_shape=jax.ShapeDtypeStruct((N, self.out_pad), jnp.float32),
            in_specs=[vmem] * 7,
            out_specs=vmem,
            compiler_params=pltpu.CompilerParams(vmem_limit_bytes=32 * 1024 * 1024),
            cost_estimate=pl.CostEstimate(flops=int(flops),
                                          transcendentals=int(self.n2),
                                          bytes_accessed=int(nbytes)),
        )(x2, self.wconv, self.bconv, self.pool, self.a0, self.weff, self.beff)

    def _forward_tiled(self, x2, N):
        """Large-batch path: batch grid + two-pass BN ('parallel' batch axis)."""
        TN = self.tile_n
        nb = N // TN
        CL, n1Lc, n2, out_pad = self.CL, self.n1Lc, self.n2, self.out_pad

        # ---- pass 1: conv + relu + pool, per-tile partial BN sums -----------
        flops1 = 2 * N * (CL * n1Lc + n1Lc * n2)
        bytes1 = (N * CL * 2 + self.wconv.size * 2 + self.bconv.size * 4
                  + self.pool.size * 2 + N * n2 * 2 + nb * 2 * n2 * 4)
        p_bf, psums = pl.pallas_call(
            stats_kernel,
            grid=(nb,),
            out_shape=(jax.ShapeDtypeStruct((N, n2), jnp.bfloat16),
                       jax.ShapeDtypeStruct((nb, 2, n2), jnp.float32)),
            in_specs=[
                pl.BlockSpec((TN, CL), lambda i: (i, 0)),
                pl.BlockSpec((CL, n1Lc), lambda i: (0, 0)),   # weights stay resident
                pl.BlockSpec((1, n1Lc), lambda i: (0, 0)),
                pl.BlockSpec((n1Lc, n2), lambda i: (0, 0)),
            ],
            out_specs=(
                pl.BlockSpec((TN, n2), lambda i: (i, 0)),
                pl.BlockSpec((1, 2, n2), lambda i: (i, 0, 0)),
            ),
            compiler_params=pltpu.CompilerParams(
                dimension_semantics=("parallel",),
                vmem_limit_bytes=32 * 1024 * 1024),
            cost_estimate=pl.CostEstimate(flops=int(flops1), transcendentals=0,
                                          bytes_accessed=int(bytes1)),
        )(x2, self.wconv, self.bconv, self.pool)

        # ---- two-pass BN glue (tiny XLA ops): exact f32 batch stats, then fold
        # the normalization into the Linear weights (rank-1 bias correction).
        sums = jnp.sum(psums, axis=0)                            # (2, n2)
        per_ch = sums.reshape(2, self.n1, self.Lb).sum(axis=-1)  # (2, n1)
        cnt = float(N * self.Lb)
        mean_c = per_ch[0] / cnt
        var_c = per_ch[1] / cnt - mean_c * mean_c
        invstd_c = jax.lax.rsqrt(var_c + self.eps)
        mean_b = jnp.repeat(mean_c, self.Lb)                     # (n2,)
        invstd_b = jnp.repeat(invstd_c, self.Lb)                 # (n2,)
        w_eff = (self.weff_f32 * invstd_b[:, None]).astype(jnp.bfloat16)
        b_eff = self.beff - ((mean_b * invstd_b)[None, :] @ self.weff_f32)

        # ---- pass 2: normalize + linear == plain tiled matmul ---------------
        flops2 = 2 * N * n2 * out_pad
        bytes2 = N * n2 * 2 + n2 * out_pad * 2 + out_pad * 4 + N * out_pad * 4
        out = pl.pallas_call(
            linear_kernel,
            grid=(nb,),
            out_shape=jax.ShapeDtypeStruct((N, out_pad), jnp.float32),
            in_specs=[
                pl.BlockSpec((TN, n2), lambda i: (i, 0)),
                pl.BlockSpec((n2, out_pad), lambda i: (0, 0)),
                pl.BlockSpec((1, out_pad), lambda i: (0, 0)),
            ],
            out_specs=pl.BlockSpec((TN, out_pad), lambda i: (i, 0)),
            compiler_params=pltpu.CompilerParams(
                dimension_semantics=("parallel",),
                vmem_limit_bytes=32 * 1024 * 1024),
            cost_estimate=pl.CostEstimate(flops=int(flops2), transcendentals=0,
                                          bytes_accessed=int(bytes2)),
        )(p_bf, w_eff, b_eff)
        return out

    def __call__(self, x):
        N, C, L = x.shape
        assert C == self.channels and L == self.L_in
        return self._forward(x)


def reference_forward(model, x):
    """Pure-JAX f32 reference matching the PyTorch forward (train-mode BN)."""
    y = jax.lax.conv_general_dilated(
        x, model.conv_w, window_strides=(model.stride1,),
        padding=[(model.padding1, model.padding1)],
        dimension_numbers=("NCH", "OIH", "NCH"))
    y = jnp.maximum(y + model.conv_b[None, :, None], 0.0)
    pooled = jax.lax.reduce_window(
        y, 0.0, jax.lax.add,
        (1, 1, model.kernel2), (1, 1, model.stride2), "VALID") / model.kernel2
    mean = pooled.mean(axis=(0, 2), keepdims=True)
    var = ((pooled - mean) ** 2).mean(axis=(0, 2), keepdims=True)
    xhat = (pooled - mean) / jnp.sqrt(var + 1e-5)
    xbn = xhat * model.gamma[None, :, None] + model.beta[None, :, None]
    flat = xbn.reshape(x.shape[0], -1)
    return flat @ model.lin_w.T + model.lin_b[None, :]


if __name__ == "__main__":
    key = jax.random.PRNGKey(0)
    k_model, k_x1, k_x2 = jax.random.split(key, 3)
    model = SequencePallas(signal_length=129, hidden=64, predict_n=1, key=k_model)

    # Small batch -> fused single-block kernel.
    N = 4
    x = jax.random.normal(k_x1, (N, model.channels, model.L_in), jnp.float32)
    out = jax.block_until_ready(model(x))
    assert out.shape == (N, model.out_dim)
    ref = reference_forward(model, x)
    # bf16 operand storage (per perf review) vs pure-f32 reference -> looser tol.
    np.testing.assert_allclose(np.asarray(out), np.asarray(ref), rtol=2e-2, atol=5e-2)

    # Larger batch -> batch-gridded two-pass path ('parallel' batch axis).
    N2 = 256
    xb = jax.random.normal(k_x2, (N2, model.channels, model.L_in), jnp.float32)
    outb = jax.block_until_ready(model(xb))
    assert outb.shape == (N2, model.out_dim)
    refb = reference_forward(model, xb)
    np.testing.assert_allclose(np.asarray(outb), np.asarray(refb), rtol=2e-2, atol=5e-2)

    print("KERNEL_OK")
</pallas_src>

<mosaic_0001>
module attributes {stable_mosaic.version = 11 : i64} {
  func.func @kernel(%arg0: memref<4x256xbf16, #tpu.memory_space<vmem>>, %arg1: memref<256x688xbf16, #tpu.memory_space<vmem>>, %arg2: memref<1x688xf32, #tpu.memory_space<vmem>>, %arg3: memref<688x160xbf16, #tpu.memory_space<vmem>>, %arg4: memref<160x160xbf16, #tpu.memory_space<vmem>>, %arg5: memref<160x128xbf16, #tpu.memory_space<vmem>>, %arg6: memref<1x128xf32, #tpu.memory_space<vmem>>, %arg7: memref<4x128xf32, #tpu.memory_space<vmem>>) attributes {dimension_semantics = [], scalar_prefetch = 0 : i64, scratch_operands = 0 : i64, tpu.core_type = #tpu.core_type<tc>} {
    %c0 = arith.constant 0 : index
    %c0_0 = arith.constant 0 : index
    %0 = vector.load %arg0[%c0, %c0_0] : memref<4x256xbf16, #tpu.memory_space<vmem>>, vector<4x256xbf16>
    %c0_1 = arith.constant 0 : index
    %c0_2 = arith.constant 0 : index
    %1 = vector.load %arg1[%c0_1, %c0_2] : memref<256x688xbf16, #tpu.memory_space<vmem>>, vector<256x688xbf16>
    %cst = arith.constant dense<0.000000e+00> : vector<4x688xf32>
    %2 = tpu.matmul %0, %1, %cst {dimension_numbers = #tpu.dot_dimension_numbers<[1], [0], [0], [1], [0, 0, 1, 1], [], []>} : vector<4x256xbf16>, vector<256x688xbf16>, vector<4x688xf32> -> vector<4x688xf32>
    %c0_3 = arith.constant 0 : index
    %c0_4 = arith.constant 0 : index
    %3 = vector.load %arg2[%c0_3, %c0_4] : memref<1x688xf32, #tpu.memory_space<vmem>>, vector<1x688xf32>
    %4 = vector.broadcast %3 : vector<1x688xf32> to vector<4x688xf32>
    %5 = arith.addf %2, %4 : vector<4x688xf32>
    %cst_5 = arith.constant 0.000000e+00 : f32
    %6 = vector.broadcast %cst_5 : f32 to vector<4x688xf32>
    %7 = arith.maximumf %5, %6 : vector<4x688xf32>
    %8 = arith.truncf %7 : vector<4x688xf32> to vector<4x688xbf16>
    %c0_6 = arith.constant 0 : index
    %c0_7 = arith.constant 0 : index
    %9 = vector.load %arg3[%c0_6, %c0_7] : memref<688x160xbf16, #tpu.memory_space<vmem>>, vector<688x160xbf16>
    %cst_8 = arith.constant dense<0.000000e+00> : vector<4x160xf32>
    %10 = tpu.matmul %8, %9, %cst_8 {dimension_numbers = #tpu.dot_dimension_numbers<[1], [0], [0], [1], [0, 0, 1, 1], [], []>} : vector<4x688xbf16>, vector<688x160xbf16>, vector<4x160xf32> -> vector<4x160xf32>
    %cst_9 = arith.constant dense<0.000000e+00> : vector<160xf32>
    %11 = vector.multi_reduction <add>, %10, %cst_9 [0] : vector<4x160xf32> to vector<160xf32>
    %12 = vector.shape_cast %11 : vector<160xf32> to vector<1x160xf32>
    %13 = arith.mulf %10, %10 : vector<4x160xf32>
    %cst_10 = arith.constant dense<0.000000e+00> : vector<160xf32>
    %14 = vector.multi_reduction <add>, %13, %cst_10 [0] : vector<4x160xf32> to vector<160xf32>
    %15 = vector.shape_cast %14 : vector<160xf32> to vector<1x160xf32>
    %16 = tpu.iota {dimensions = array<i32: 0>} : vector<2x160xi32>
    %c0_i32 = arith.constant 0 : i32
    %17 = vector.broadcast %c0_i32 : i32 to vector<2x160xi32>
    %18 = arith.cmpi eq, %16, %17 : vector<2x160xi32>
    %19 = vector.shape_cast %12 : vector<1x160xf32> to vector<1x160xf32>
    %20 = vector.broadcast %19 : vector<1x160xf32> to vector<2x160xf32>
    %21 = vector.shape_cast %15 : vector<1x160xf32> to vector<1x160xf32>
    %22 = vector.broadcast %21 : vector<1x160xf32> to vector<2x160xf32>
    %23 = arith.select %18, %20, %22 : vector<2x160xi1>, vector<2x160xf32>
    %c0_11 = arith.constant 0 : index
    %c0_12 = arith.constant 0 : index
    %24 = vector.load %arg4[%c0_11, %c0_12] : memref<160x160xbf16, #tpu.memory_space<vmem>>, vector<160x160xbf16>
    %cst_13 = arith.constant dense<0.000000e+00> : vector<2x160xf32>
    %25 = tpu.matmul %23, %24, %cst_13 {dimension_numbers = #tpu.dot_dimension_numbers<[1], [0], [0], [1], [0, 0, 1, 1], [], []>} : vector<2x160xf32>, vector<160x160xbf16>, vector<2x160xf32> -> vector<2x160xf32>
    %cst_14 = arith.constant 2.500000e-02 : f32
    %26 = vector.broadcast %cst_14 : f32 to vector<2x160xf32>
    %27 = arith.mulf %25, %26 : vector<2x160xf32>
    %28 = vector.extract_strided_slice %27 {offsets = [0, 0], sizes = [1, 160], strides = [1, 1]} : vector<2x160xf32> to vector<1x160xf32>
    %29 = vector.extract_strided_slice %27 {offsets = [1, 0], sizes = [1, 160], strides = [1, 1]} : vector<2x160xf32> to vector<1x160xf32>
    %30 = arith.mulf %28, %28 : vector<1x160xf32>
    %31 = arith.subf %29, %30 : vector<1x160xf32>
    %cst_15 = arith.constant 9.99999974E-6 : f32
    %32 = vector.broadcast %cst_15 : f32 to vector<1x160xf32>
    %33 = arith.addf %31, %32 : vector<1x160xf32>
    %34 = math.rsqrt %33 : vector<1x160xf32>
    %35 = vector.broadcast %34 : vector<1x160xf32> to vector<4x160xf32>
    %36 = arith.mulf %10, %35 : vector<4x160xf32>
    %37 = arith.truncf %36 : vector<4x160xf32> to vector<4x160xbf16>
    %c0_16 = arith.constant 0 : index
    %c0_17 = arith.constant 0 : index
    %38 = vector.load %arg5[%c0_16, %c0_17] : memref<160x128xbf16, #tpu.memory_space<vmem>>, vector<160x128xbf16>
    %cst_18 = arith.constant dense<0.000000e+00> : vector<4x128xf32>
    %39 = tpu.matmul %37, %38, %cst_18 {dimension_numbers = #tpu.dot_dimension_numbers<[1], [0], [0], [1], [0, 0, 1, 1], [], []>} : vector<4x160xbf16>, vector<160x128xbf16>, vector<4x128xf32> -> vector<4x128xf32>
    %40 = arith.mulf %28, %34 : vector<1x160xf32>
    %41 = arith.truncf %40 : vector<1x160xf32> to vector<1x160xbf16>
    %c0_19 = arith.constant 0 : index
    %c0_20 = arith.constant 0 : index
    %42 = vector.load %arg5[%c0_19, %c0_20] : memref<160x128xbf16, #tpu.memory_space<vmem>>, vector<160x128xbf16>
    %cst_21 = arith.constant dense<0.000000e+00> : vector<1x128xf32>
    %43 = tpu.matmul %41, %42, %cst_21 {dimension_numbers = #tpu.dot_dimension_numbers<[1], [0], [0], [1], [0, 0, 1, 1], [], []>} : vector<1x160xbf16>, vector<160x128xbf16>, vector<1x128xf32> -> vector<1x128xf32>
    %c0_22 = arith.constant 0 : index
    %c0_23 = arith.constant 0 : index
    %44 = vector.load %arg6[%c0_22, %c0_23] : memref<1x128xf32, #tpu.memory_space<vmem>>, vector<1x128xf32>
    %45 = arith.subf %44, %43 : vector<1x128xf32>
    %46 = vector.broadcast %45 : vector<1x128xf32> to vector<4x128xf32>
    %47 = arith.addf %39, %46 : vector<4x128xf32>
    %c0_24 = arith.constant 0 : index
    %c0_25 = arith.constant 0 : index
    %48 = vector.load %arg7[%c0_24, %c0_25] : memref<4x128xf32, #tpu.memory_space<vmem>>, vector<4x128xf32>
    tpu.vector_store %arg7[%c0_24, %c0_25], %47 {strides = array<i32>} : memref<4x128xf32, #tpu.memory_space<vmem>>, vector<4x128xf32>,
    return
  }
}

</mosaic_0001>

<bundles_post_ra>
// kernel: _forward_impl.1
= control target key start
LH: loop header
LB: loop body
LE: loop exit
PB: predicated region body
PF: predicated region fallthrough
CT: control target
= control target key end

     0   :  { %12 = vsyncpa [#allocation3], 0  ;;  %s3304_s0 = inlined_call_operand.vmem [shape: bf16[4,256], index: 0, kind: input, shape index: {}]   ;;  %s3305_s1 = inlined_call_operand.hbm [shape: bf16[256,688], index: 1, kind: input, shape index: {}]   ;;  %s3306_s2 = inlined_call_operand.vmem [shape: f32[1,688], index: 2, kind: input, shape index: {}]   ;;  %s3307_s3 = inlined_call_operand.hbm [shape: bf16[688,160], index: 3, kind: input, shape index: {}]   ;;  %s3308_s4 = inlined_call_operand.hbm [shape: bf16[160,160], index: 4, kind: input, shape index: {}]   ;;  %s3309_s5 = inlined_call_operand.hbm [shape: bf16[160,128], index: 5, kind: input, shape index: {}]   ;;  %s3310_s6 = inlined_call_operand.vmem [shape: f32[1,128], index: 6, kind: input, shape index: {}]   ;;  %s3311_s7 = inlined_call_operand.hbm [shape: f32[4,128], index: 7, kind: output, shape index: {}]  }
   0x1   :  { %13 = vsyncpa [#allocation6], 0 }
   0x2   :  { %14 = vsyncpa [#allocation9], 0  ;;  %s37_s26 = sshll.u32 %s3307_s3, 4  ;;  %s38_s26 = int_to_ptr.hbm [resolvable:$true] %s37_s26 }
   0x3   :  { %15 = vsyncpa [#allocation4], 0  ;;  %s3163_s27 = smov [#allocation5]   ;;  %s22_s8 = sshll.u32 %s3305_s1, 4  ;;  %s23_s8 = int_to_ptr.hbm [resolvable:$true] %s22_s8 }
   0x4   :  { %s39_s28 = sshll.u32 %s3163_s27, 4  ;;  %s3164_s9 = smov 128   ;;  %s40_s28 = int_to_ptr.vmem [resolvable:$true] %s39_s28 }
   0x5   :  { %s3165_s10 = smov 8   ;;  %s3166_s11 = smov [#allocation2]  }
   0x6   :  { %45 = dma.hbm_to_vmem [thread:$0]  %s38_s26, 11008, %s40_s28, [#allocation6], %s3164_s9, %s3164_s9, %s3165_s10  }
   0x7   :  { %s24_s12 = sshll.u32 %s3166_s11, 4  ;;  %s3167_s13 = smov 384   ;;  %s25_s12 = int_to_ptr.vmem [resolvable:$true] %s24_s12 }
   0x8   :  { %s3168_s14 = smov 24   ;;  %s50_s16 = sshll.u32 %s3308_s4, 4  ;;  %s51_s16 = int_to_ptr.hbm [resolvable:$true] %s50_s16 }
   0x9   :  { %30 = dma.hbm_to_vmem [thread:$0]  %s23_s8, 12288, %s25_s12, [#allocation3], %s3167_s13, %s3167_s13, %s3168_s14  }
   0xa   :  { %s3169_s17 = smov [#allocation7]   ;;  %s63_s20 = sshll.u32 %s3309_s5, 4  ;;  %s64_s20 = int_to_ptr.hbm [resolvable:$true] %s63_s20 }
   0xb   :  { %s52_s18 = sshll.u32 %s3169_s17, 4  ;;  %s3170_s21 = smov [#allocation8]   ;;  %s53_s18 = int_to_ptr.vmem [resolvable:$true] %s52_s18 }
   0xc   :  { %58 = dma.hbm_to_vmem [thread:$0]  %s51_s16, 2560, %s53_s18, [#allocation6], %s3164_s9, %s3164_s9, %s3165_s10  }
   0xd   :  { %s65_s22 = sshll.u32 %s3170_s21, 4  ;;  %s3171_s23 = smov 64   ;;  %s66_s22 = int_to_ptr.vmem [resolvable:$true] %s65_s22 }
   0xe   :  { %s3172_s24 = smov 4  }
   0xf   :  { %71 = dma.hbm_to_vmem [thread:$0]  %s64_s20, 1280, %s66_s22, [#allocation9], %s3171_s23, %s3171_s23, %s3172_s24  }
  0x10   :  { %3155 = dma.done.wait [#allocation3], 12288  }
  0x11   :  { %3156 = vsyncadd [#allocation3], 4294955008 }
  0x12   :  { %3157 = dma.done.wait [#allocation6], 13568  }
  0x13   :  { %3158 = vsyncadd [#allocation6], 4294953728 }
  0x14   :  { %3159 = dma.done.wait [#allocation9], 1280  }
  0x15   :  { %3160 = vsyncadd [#allocation9], 4294966016  ;;  %v2124_v0 = vld [vmem:[#allocation2 + $0x150] sm:$0xf]  ;;  %v2853_v1 = vld [vmem:[#allocation2 + $0x164] sm:$0xf0] }
  0x16   :  { %v2316_v2 = vld [vmem:[#allocation2 + $0x2d0] sm:$0xf]  ;;  %v2125_v3 = vor.u32 %v2853_v1, %v2124_v0  ;;  %v2901_v4 = vld [vmem:[#allocation2 + $0x2e4] sm:$0xf0]  ;;  %v2850_v5 = vld [vmem:[#allocation2 + $0x154] sm:$0xf] }
  0x17   :  { %v2126_v6 = vld [vmem:[#allocation2 + $0x168] sm:$0xf0]  ;;  %v2317_v7 = vor.u32 %v2901_v4, %v2316_v2  ;;  %v2898_v9 = vld [vmem:[#allocation2 + $0x2d4] sm:$0xf]  ;;  %v2100_v11 = vld [vmem:[#allocation2 + $0x120] sm:$0xf] }
  0x18   :  { %v2129_v8 = vor.u32 %v2850_v5, %v2126_v6  ;;  %v2318_v10 = vld [vmem:[#allocation2 + $0x2e8] sm:$0xf0]  ;;  %688 = vmatpush.bf16.msra.mxu0 %v2125_v3  ;;  %v2847_v13 = vld [vmem:[#allocation2 + $0x134] sm:$0xf0]  ;;  %v2292_v14 = vld [vmem:[#allocation2 + $0x2a0] sm:$0xf] }
  0x19   :  { %v2321_v12 = vor.u32 %v2898_v9, %v2318_v10  ;;  %v2895_v15 = vld [vmem:[#allocation2 + $0x2b4] sm:$0xf0]  ;;  %701 = vmatpush.bf16.msra.mxu1 %v2317_v7  ;;  %v2101_v16 = vor.u32 %v2847_v13, %v2100_v11  ;;  %v2844_v18 = vld [vmem:[#allocation2 + $0x124] sm:$0xf]  ;;  %v2102_v19 = vld [vmem:[#allocation2 + $0x138] sm:$0xf0] }
  0x1a   :  { %714 = vmatpush.bf16.msra.mxu2 %v2129_v8  ;;  %v2293_v17 = vor.u32 %v2895_v15, %v2292_v14  ;;  %v2892_v20 = vld [vmem:[#allocation2 + $0x2a4] sm:$0xf]  ;;  %v2105_v21 = vor.u32 %v2844_v18, %v2102_v19  ;;  %v2294_v22 = vld [vmem:[#allocation2 + $0x2b8] sm:$0xf0]  ;;  %v2076_v23 = vld [vmem:[#allocation2 + $0xf0] sm:$0xf] }
  0x1b   :  { %727 = vmatpush.bf16.msra.mxu3 %v2321_v12  ;;  %v2841_v24 = vld [vmem:[#allocation2 + $0x104] sm:$0xf0]  ;;  %v2297_v25 = vor.u32 %v2892_v20, %v2294_v22  ;;  %v2268_v26 = vld [vmem:[#allocation2 + $0x270] sm:$0xf]  ;;  %v2838_v28 = vld [vmem:[#allocation2 + $0xf4] sm:$0xf] }
  0x1c   :  { %v2889_v27 = vld [vmem:[#allocation2 + $0x284] sm:$0xf0]  ;;  %689 = vmatpush.bf16.msra.mxu0 %v2101_v16  ;;  %v2077_v29 = vor.u32 %v2841_v24, %v2076_v23  ;;  %v2078_v30 = vld [vmem:[#allocation2 + $0x108] sm:$0xf0]  ;;  %v2886_v31 = vld [vmem:[#allocation2 + $0x274] sm:$0xf] }
  0x1d   :  { %v2270_v32 = vld [vmem:[#allocation2 + $0x288] sm:$0xf0]  ;;  %702 = vmatpush.bf16.msra.mxu1 %v2293_v17  ;;  %v2269_v33 = vor.u32 %v2889_v27, %v2268_v26  ;;  %v2081_v34 = vor.u32 %v2838_v28, %v2078_v30  ;;  %v2052_v35 = vld [vmem:[#allocation2 + $0xc0] sm:$0xf]  ;;  %v2835_v36 = vld [vmem:[#allocation2 + $0xd4] sm:$0xf0] }
  0x1e   :  { %715 = vmatpush.bf16.msra.mxu2 %v2105_v21  ;;  %v2244_v37 = vld [vmem:[#allocation2 + $0x240] sm:$0xf]  ;;  %v2273_v38 = vor.u32 %v2886_v31, %v2270_v32  ;;  %v2883_v39 = vld [vmem:[#allocation2 + $0x254] sm:$0xf0]  ;;  %v2832_v40 = vld [vmem:[#allocation2 + $0xc4] sm:$0xf]  ;;  %v2053_v44 = vor.u32 %v2835_v36, %v2052_v35 }
  0x1f   :  { %728 = vmatpush.bf16.msra.mxu3 %v2297_v25  ;;  %v2054_v41 = vld [vmem:[#allocation2 + $0xd8] sm:$0xf0]  ;;  %v2880_v42 = vld [vmem:[#allocation2 + $0x244] sm:$0xf]  ;;  %v2245_v45 = vor.u32 %v2883_v39, %v2244_v37  ;;  %v2028_v47 = vld [vmem:[#allocation2 + $0x90] sm:$0xf] }
  0x20   :  { %v2246_v43 = vld [vmem:[#allocation2 + $0x258] sm:$0xf0]  ;;  %690 = vmatpush.bf16.msra.mxu0 %v2077_v29  ;;  %v2057_v46 = vor.u32 %v2832_v40, %v2054_v41  ;;  %v2829_v48 = vld [vmem:[#allocation2 + $0xa4] sm:$0xf0]  ;;  %v2220_v49 = vld [vmem:[#allocation2 + $0x210] sm:$0xf] }
  0x21   :  { %703 = vmatpush.bf16.msra.mxu1 %v2269_v33  ;;  %v2249_v50 = vor.u32 %v2880_v42, %v2246_v43  ;;  %v2877_v51 = vld [vmem:[#allocation2 + $0x224] sm:$0xf0]  ;;  %v2826_v52 = vld [vmem:[#allocation2 + $0x94] sm:$0xf]  ;;  %v2030_v53 = vld [vmem:[#allocation2 + $0xa8] sm:$0xf0]  ;;  %v2029_v56 = vor.u32 %v2829_v48, %v2028_v47 }
  0x22   :  { %716 = vmatpush.bf16.msra.mxu2 %v2081_v34  ;;  %v2874_v54 = vld [vmem:[#allocation2 + $0x214] sm:$0xf]  ;;  %v2222_v55 = vld [vmem:[#allocation2 + $0x228] sm:$0xf0]  ;;  %v2221_v57 = vor.u32 %v2877_v51, %v2220_v49  ;;  %v2033_v58 = vor.u32 %v2826_v52, %v2030_v53  ;;  %v2004_v59 = vld [vmem:[#allocation2 + $0x60] sm:$0xf] }
  0x23   :  { %729 = vmatpush.bf16.msra.mxu3 %v2273_v38  ;;  %v2823_v60 = vld [vmem:[#allocation2 + $0x74] sm:$0xf0]  ;;  %v2196_v61 = vld [vmem:[#allocation2 + $0x1e0] sm:$0xf]  ;;  %v2225_v62 = vor.u32 %v2874_v54, %v2222_v55  ;;  %v2820_v0 = vld [vmem:[#allocation2 + $0x64] sm:$0xf] }
  0x24   :  { %691 = vmatpush.bf16.msra.mxu0 %v2053_v44  ;;  %v2871_v63 = vld [vmem:[#allocation2 + $0x1f4] sm:$0xf0]  ;;  %v2006_v1 = vld [vmem:[#allocation2 + $0x78] sm:$0xf0]  ;;  %v2868_v2 = vld [vmem:[#allocation2 + $0x1e4] sm:$0xf]  ;;  %v2005_v4 = vor.u32 %v2823_v60, %v2004_v59 }
  0x25   :  { %704 = vmatpush.bf16.msra.mxu1 %v2245_v45  ;;  %v2198_v3 = vld [vmem:[#allocation2 + $0x1f8] sm:$0xf0]  ;;  %v2197_v5 = vor.u32 %v2871_v63, %v2196_v61  ;;  %v2009_v6 = vor.u32 %v2820_v0, %v2006_v1  ;;  %v1980_v7 = vld [vmem:[#allocation2 + $0x30] sm:$0xf]  ;;  %v2817_v8 = vld [vmem:[#allocation2 + $0x44] sm:$0xf0] }
  0x26   :  { %717 = vmatpush.bf16.msra.mxu2 %v2057_v46  ;;  %v2172_v9 = vld [vmem:[#allocation2 + $0x1b0] sm:$0xf]  ;;  %v2201_v10 = vor.u32 %v2868_v2, %v2198_v3  ;;  %v2865_v11 = vld [vmem:[#allocation2 + $0x1c4] sm:$0xf0]  ;;  %v2814_v12 = vld [vmem:[#allocation2 + $0x34] sm:$0xf]  ;;  %v1981_v16 = vor.u32 %v2817_v8, %v1980_v7 }
  0x27   :  { %730 = vmatpush.bf16.msra.mxu3 %v2249_v50  ;;  %v1982_v13 = vld [vmem:[#allocation2 + $0x48] sm:$0xf0]  ;;  %v2862_v14 = vld [vmem:[#allocation2 + $0x1b4] sm:$0xf]  ;;  %v1956_v17 = vld [vmem:[#allocation2] sm:$0xf]  ;;  %v2173_v19 = vor.u32 %v2865_v11, %v2172_v9 }
  0x28   :  { %692 = vmatpush.bf16.msra.mxu0 %v2029_v56  ;;  %v2174_v15 = vld [vmem:[#allocation2 + $0x1c8] sm:$0xf0]  ;;  %v2811_v18 = vld [vmem:[#allocation2 + $0x14] sm:$0xf0]  ;;  %v1985_v20 = vor.u32 %v2814_v12, %v1982_v13  ;;  %v2148_v21 = vld [vmem:[#allocation2 + $0x180] sm:$0xf] }
  0x29   :  { %705 = vmatpush.bf16.msra.mxu1 %v2221_v57  ;;  %v2859_v22 = vld [vmem:[#allocation2 + $0x194] sm:$0xf0]  ;;  %v2808_v23 = vld [vmem:[#allocation2 + $0x4] sm:$0xf]  ;;  %v2177_v24 = vor.u32 %v2862_v14, %v2174_v15  ;;  %v1958_v25 = vld [vmem:[#allocation2 + $0x18] sm:$0xf0]  ;;  %v1957_v31 = vor.u32 %v2811_v18, %v1956_v17 }
  0x2a   :  { %718 = vmatpush.bf16.msra.mxu2 %v2033_v58  ;;  %v2132_v26 = vld [vmem:[#allocation2 + $0x158] sm:$0xf]  ;;  %v2854_v27 = vld [vmem:[#allocation2 + $0x16c] sm:$0xf0]  ;;  %v2851_v30 = vld [vmem:[#allocation2 + $0x15c] sm:$0xf]  ;;  %v2149_v35 = vor.u32 %v2859_v22, %v2148_v21  ;;  %v1961_v36 = vor.u32 %v2808_v23, %v1958_v25 }
  0x2b   :  { %731 = vmatpush.bf16.msra.mxu3 %v2225_v62  ;;  %v2324_v28 = vld [vmem:[#allocation2 + $0x2d8] sm:$0xf]  ;;  %v2902_v29 = vld [vmem:[#allocation2 + $0x2ec] sm:$0xf0]  ;;  %v2134_v32 = vld [vmem:[#allocation2 + $0x170] sm:$0xf0]  ;;  %v2133_v39 = vor.u32 %v2854_v27, %v2132_v26 }
  0x2c   :  { %693 = vmatpush.bf16.msra.mxu0 %v2005_v4  ;;  %v2856_v33 = vld [vmem:[#allocation2 + $0x184] sm:$0xf]  ;;  %v2150_v34 = vld [vmem:[#allocation2 + $0x198] sm:$0xf0]  ;;  %v2326_v38 = vld [vmem:[#allocation2 + $0x2f0] sm:$0xf0]  ;;  %v2325_v40 = vor.u32 %v2902_v29, %v2324_v28  ;;  %v2137_v42 = vor.u32 %v2851_v30, %v2134_v32 }
  0x2d   :  { %706 = vmatpush.bf16.msra.mxu1 %v2197_v5  ;;  %v2899_v37 = vld [vmem:[#allocation2 + $0x2dc] sm:$0xf]  ;;  %v2108_v41 = vld [vmem:[#allocation2 + $0x128] sm:$0xf]  ;;  %v2153_v43 = vor.u32 %v2856_v33, %v2150_v34  ;;  %v2848_v44 = vld [vmem:[#allocation2 + $0x13c] sm:$0xf0] }
  0x2e   :  { %719 = vmatpush.bf16.msra.mxu2 %v2009_v6  ;;  %v2300_v45 = vld [vmem:[#allocation2 + $0x2a8] sm:$0xf]  ;;  %v2896_v46 = vld [vmem:[#allocation2 + $0x2bc] sm:$0xf0]  ;;  %v2329_v47 = vor.u32 %v2899_v37, %v2326_v38  ;;  %v2845_v48 = vld [vmem:[#allocation2 + $0x12c] sm:$0xf]  ;;  %v2109_v53 = vor.u32 %v2848_v44, %v2108_v41 }
  0x2f   :  { %732 = vmatpush.bf16.msra.mxu3 %v2201_v10  ;;  %v2110_v49 = vld [vmem:[#allocation2 + $0x140] sm:$0xf0]  ;;  %v91_v50 = vld [vmem:[%s3304_s0] sm:$0xf]  ;;  %v2893_v51 = vld [vmem:[#allocation2 + $0x2ac] sm:$0xf]  ;;  %v2301_v54 = vor.u32 %v2896_v46, %v2300_v45 }
  0x30   :  { %694 = vmatpush.bf16.msra.mxu0 %v1981_v16  ;;  %v2302_v52 = vld [vmem:[#allocation2 + $0x2c0] sm:$0xf0]  ;;  %203 = vst [vmem:[#allocation1] ss:$4 sm:$0xff] %v91_v50  ;;  %v2084_v55 = vld [vmem:[#allocation2 + $0xf8] sm:$0xf]  ;;  %v2113_v56 = vor.u32 %v2845_v48, %v2110_v49 }
  0x31   :  { %707 = vmatpush.bf16.msra.mxu1 %v2173_v19  ;;  %v2842_v57 = vld [vmem:[#allocation2 + $0x10c] sm:$0xf0]  ;;  %v2276_v58 = vld [vmem:[#allocation2 + $0x278] sm:$0xf]  ;;  %v2305_v60 = vor.u32 %v2893_v51, %v2302_v52  ;;  %v2839_v61 = vld [vmem:[#allocation2 + $0xfc] sm:$0xf] }
  0x32   :  { %720 = vmatpush.bf16.msra.mxu2 %v1985_v20  ;;  %v2890_v59 = vld [vmem:[#allocation2 + $0x28c] sm:$0xf0]  ;;  %v2086_v62 = vld [vmem:[#allocation2 + $0x110] sm:$0xf0]  ;;  %v2887_v63 = vld [vmem:[#allocation2 + $0x27c] sm:$0xf]  ;;  %v2085_v1 = vor.u32 %v2842_v57, %v2084_v55 }
  0x33   :  { %733 = vmatpush.bf16.msra.mxu3 %v2177_v24  ;;  %v2278_v0 = vld [vmem:[#allocation2 + $0x290] sm:$0xf0]  ;;  %v2277_v2 = vor.u32 %v2890_v59, %v2276_v58  ;;  %v2060_v3 = vld [vmem:[#allocation2 + $0xc8] sm:$0xf]  ;;  %v2836_v4 = vld [vmem:[#allocation2 + $0xdc] sm:$0xf0]  ;;  %v2089_v6 = vor.u32 %v2839_v61, %v2086_v62 }
  0x34   :  { %695 = vmatpush.bf16.msra.mxu0 %v1957_v31  ;;  %v2252_v5 = vld [vmem:[#allocation2 + $0x248] sm:$0xf]  ;;  %v2884_v7 = vld [vmem:[#allocation2 + $0x25c] sm:$0xf0]  ;;  %v2833_v8 = vld [vmem:[#allocation2 + $0xcc] sm:$0xf]  ;;  %v2281_v10 = vor.u32 %v2887_v63, %v2278_v0  ;;  %v2061_v15 = vor.u32 %v2836_v4, %v2060_v3 }
  0x35   :  { %708 = vmatpush.bf16.msra.mxu1 %v2149_v35  ;;  %v2062_v9 = vld [vmem:[#allocation2 + $0xe0] sm:$0xf0]  ;;  %v2881_v13 = vld [vmem:[#allocation2 + $0x24c] sm:$0xf]  ;;  %v2253_v16 = vor.u32 %v2884_v7, %v2252_v5  ;;  %v2036_v17 = vld [vmem:[#allocation2 + $0x98] sm:$0xf] }
  0x36   :  { %721 = vmatpush.bf16.msra.mxu2 %v1961_v36  ;;  %v2254_v14 = vld [vmem:[#allocation2 + $0x260] sm:$0xf0]  ;;  %v2065_v18 = vor.u32 %v2833_v8, %v2062_v9  ;;  %v2830_v19 = vld [vmem:[#allocation2 + $0xac] sm:$0xf0]  ;;  %v2228_v20 = vld [vmem:[#allocation2 + $0x218] sm:$0xf] }
  0x37   :  { %734 = vmatpush.bf16.msra.mxu3 %v2153_v43  ;;  %v3229_v11 = vld.sshfl [vmem:[#allocation1] sm:$0xff pattern:$0x73625140]  ;;  %v3231_v12 = vld.sshfl [vmem:[#allocation1 + $0x8] sm:$0xff pattern:$0x73625140]  ;;  %v2257_v22 = vor.u32 %v2881_v13, %v2254_v14  ;;  %v2037_v27 = vor.u32 %v2830_v19, %v2036_v17 }
  0x38   :  { %740 = vmatpush.bf16.msrb.mxu0 %v2133_v39  ;;  %v2878_v21 = vld [vmem:[#allocation2 + $0x22c] sm:$0xf0]  ;;  %v2827_v23 = vld [vmem:[#allocation2 + $0x9c] sm:$0xf]  ;;  %v2038_v24 = vld [vmem:[#allocation2 + $0xb0] sm:$0xf0]  ;;  %709 = vmatmul.bf16.vlgmr.msra.gmra.mxu1 %v3231_v12 }
  0x39   :  { %753 = vmatpush.bf16.msrb.mxu1 %v2325_v40  ;;  %722 = vmatmul.bf16.vlgmr.msra.gmra.mxu2 %v3229_v11  ;;  %v2875_v25 = vld [vmem:[#allocation2 + $0x21c] sm:$0xf]  ;;  %v2230_v26 = vld [vmem:[#allocation2 + $0x230] sm:$0xf0]  ;;  %v2229_v28 = vor.u32 %v2878_v21, %v2228_v20  ;;  %v2012_v29 = vld [vmem:[#allocation2 + $0x68] sm:$0xf]  ;;  %v2041_v30 = vor.u32 %v2827_v23, %v2038_v24 }
  0x3a   :  { %766 = vmatpush.bf16.msrb.mxu2 %v2137_v42  ;;  %696 = vmatmul.bf16.vlgmr.msra.gmra.mxu0 %v3229_v11  ;;  %v2824_v31 = vld [vmem:[#allocation2 + $0x7c] sm:$0xf0]  ;;  %v2204_v32 = vld [vmem:[#allocation2 + $0x1e8] sm:$0xf]  ;;  %v2233_v34 = vor.u32 %v2875_v25, %v2230_v26  ;;  %v2821_v35 = vld [vmem:[#allocation2 + $0x6c] sm:$0xf] }
  0x3b   :  { %779 = vmatpush.bf16.msrb.mxu3 %v2329_v47  ;;  %v2872_v33 = vld [vmem:[#allocation2 + $0x1fc] sm:$0xf0]  ;;  %v2014_v36 = vld [vmem:[#allocation2 + $0x80] sm:$0xf0]  ;;  %v2869_v37 = vld [vmem:[#allocation2 + $0x1ec] sm:$0xf]  ;;  %v2013_v39 = vor.u32 %v2824_v31, %v2012_v29 }
  0x3c   :  { %741 = vmatpush.bf16.msrb.mxu0 %v2109_v53  ;;  %735 = vmatmul.bf16.vlgmr.msra.gmra.mxu3 %v3231_v12  ;;  %v2206_v38 = vld [vmem:[#allocation2 + $0x200] sm:$0xf0]  ;;  %v2205_v40 = vor.u32 %v2872_v33, %v2204_v32  ;;  %v1988_v41 = vld [vmem:[#allocation2 + $0x38] sm:$0xf]  ;;  %v2017_v42 = vor.u32 %v2821_v35, %v2014_v36  ;;  %v2818_v43 = vld [vmem:[#allocation2 + $0x4c] sm:$0xf0] }
  0x3d   :  { %754 = vmatpush.bf16.msrb.mxu1 %v2301_v54  ;;  %v2180_v44 = vld [vmem:[#allocation2 + $0x1b8] sm:$0xf]  ;;  %v2866_v45 = vld [vmem:[#allocation2 + $0x1cc] sm:$0xf0]  ;;  %v2209_v46 = vor.u32 %v2869_v37, %v2206_v38  ;;  %v2815_v47 = vld [vmem:[#allocation2 + $0x3c] sm:$0xf]  ;;  %v1989_v51 = vor.u32 %v2818_v43, %v1988_v41 }
  0x3e   :  { %767 = vmatpush.bf16.msrb.mxu2 %v2113_v56  ;;  %v1990_v48 = vld [vmem:[#allocation2 + $0x50] sm:$0xf0]  ;;  %v2863_v49 = vld [vmem:[#allocation2 + $0x1bc] sm:$0xf]  ;;  %v2181_v52 = vor.u32 %v2866_v45, %v2180_v44  ;;  %v1964_v53 = vld [vmem:[#allocation2 + $0x8] sm:$0xf] }
  0x3f   :  { %780 = vmatpush.bf16.msrb.mxu3 %v2305_v60  ;;  %v2182_v50 = vld [vmem:[#allocation2 + $0x1d0] sm:$0xf0]  ;;  %v2812_v54 = vld [vmem:[#allocation2 + $0x1c] sm:$0xf0]  ;;  %v2156_v55 = vld [vmem:[#allocation2 + $0x188] sm:$0xf]  ;;  %v1993_v56 = vor.u32 %v2815_v47, %v1990_v48 }
  0x40   :  { %742 = vmatpush.bf16.msrb.mxu0 %v2085_v1  ;;  %v2860_v57 = vld [vmem:[#allocation2 + $0x19c] sm:$0xf0]  ;;  %v2809_v58 = vld [vmem:[#allocation2 + $0xc] sm:$0xf]  ;;  %v1966_v59 = vld [vmem:[#allocation2 + $0x20] sm:$0xf0]  ;;  %v2185_v60 = vor.u32 %v2863_v49, %v2182_v50  ;;  %v1965_v3 = vor.u32 %v2812_v54, %v1964_v53 }
  0x41   :  { %755 = vmatpush.bf16.msrb.mxu1 %v2277_v2  ;;  %v2140_v61 = vld [vmem:[#allocation2 + $0x160] sm:$0xf]  ;;  %v2855_v62 = vld [vmem:[#allocation2 + $0x174] sm:$0xf0]  ;;  %v2857_v1 = vld [vmem:[#allocation2 + $0x18c] sm:$0xf]  ;;  %v2157_v4 = vor.u32 %v2860_v57, %v2156_v55  ;;  %v1969_v7 = vor.u32 %v2809_v58, %v1966_v59 }
  0x42   :  { %768 = vmatpush.bf16.msrb.mxu2 %v2089_v6  ;;  %v2332_v63 = vld [vmem:[#allocation2 + $0x2e0] sm:$0xf]  ;;  %v2903_v0 = vld [vmem:[#allocation2 + $0x2f4] sm:$0xf0]  ;;  %v2158_v2 = vld [vmem:[#allocation2 + $0x1a0] sm:$0xf0]  ;;  %v2141_v8 = vor.u32 %v2855_v62, %v2140_v61 }
  0x43   :  { %781 = vmatpush.bf16.msrb.mxu3 %v2281_v10  ;;  %v2852_v5 = vld [vmem:[#allocation2 + $0x164] sm:$0xf]  ;;  %v2142_v6 = vld [vmem:[#allocation2 + $0x178] sm:$0xf0]  ;;  %v2333_v9 = vor.u32 %v2903_v0, %v2332_v63  ;;  %v2161_v10 = vor.u32 %v2857_v1, %v2158_v2  ;;  %v2116_v13 = vld [vmem:[#allocation2 + $0x130] sm:$0xf] }
  0x44   :  { %743 = vmatpush.bf16.msrb.mxu0 %v2061_v15  ;;  %v2849_v14 = vld [vmem:[#allocation2 + $0x144] sm:$0xf0]  ;;  %v2308_v15 = vld [vmem:[#allocation2 + $0x2b0] sm:$0xf]  ;;  %v2334_v19 = vld [vmem:[#allocation2 + $0x2f8] sm:$0xf0] }
  0x45   :  { %756 = vmatpush.bf16.msrb.mxu1 %v2253_v16  ;;  %v2145_v16 = vor.u32 %v2852_v5, %v2142_v6  ;;  %v2897_v17 = vld [vmem:[#allocation2 + $0x2c4] sm:$0xf0]  ;;  %v2846_v20 = vld [vmem:[#allocation2 + $0x134] sm:$0xf]  ;;  %v2118_v21 = vld [vmem:[#allocation2 + $0x148] sm:$0xf0] }
  0x46   :  { %769 = vmatpush.bf16.msrb.mxu2 %v2065_v18  ;;  %v2900_v18 = vld [vmem:[#allocation2 + $0x2e4] sm:$0xf]  ;;  %v2309_v23 = vor.u32 %v2897_v17, %v2308_v15  ;;  %v2092_v25 = vld [vmem:[#allocation2 + $0x100] sm:$0xf]  ;;  %v2843_v26 = vld [vmem:[#allocation2 + $0x114] sm:$0xf0] }
  0x47   :  { %782 = vmatpush.bf16.msrb.mxu3 %v2257_v22  ;;  %v2117_v22 = vor.u32 %v2849_v14, %v2116_v13  ;;  %v2337_v24 = vor.u32 %v2900_v18, %v2334_v19  ;;  %v2891_v29 = vld [vmem:[#allocation2 + $0x294] sm:$0xf0]  ;;  %v2310_v31 = vld [vmem:[#allocation2 + $0x2c8] sm:$0xf0]  ;;  %v2840_v32 = vld [vmem:[#allocation2 + $0x104] sm:$0xf] }
  0x48   :  { %744 = vmatpush.bf16.msrb.mxu0 %v2037_v27  ;;  %v2284_v27 = vld [vmem:[#allocation2 + $0x280] sm:$0xf]  ;;  %v2094_v33 = vld [vmem:[#allocation2 + $0x118] sm:$0xf0]  ;;  %v2068_v37 = vld [vmem:[#allocation2 + $0xd0] sm:$0xf] }
  0x49   :  { %757 = vmatpush.bf16.msrb.mxu1 %v2229_v28  ;;  %v2121_v28 = vor.u32 %v2846_v20, %v2118_v21  ;;  %v2285_v35 = vor.u32 %v2891_v29, %v2284_v27  ;;  %v2837_v38 = vld [vmem:[#allocation2 + $0xe4] sm:$0xf0]  ;;  %v2286_v43 = vld [vmem:[#allocation2 + $0x298] sm:$0xf0]  ;;  %v2834_v44 = vld [vmem:[#allocation2 + $0xd4] sm:$0xf] }
  0x4a   :  { %770 = vmatpush.bf16.msrb.mxu2 %v2041_v30  ;;  %v2894_v30 = vld [vmem:[#allocation2 + $0x2b4] sm:$0xf]  ;;  %v2885_v41 = vld [vmem:[#allocation2 + $0x264] sm:$0xf0]  ;;  %v2070_v45 = vld [vmem:[#allocation2 + $0xe8] sm:$0xf0] }
  0x4b   :  { %783 = vmatpush.bf16.msrb.mxu3 %v2233_v34  ;;  %v2093_v34 = vor.u32 %v2843_v26, %v2092_v25  ;;  %v2313_v36 = vor.u32 %v2894_v30, %v2310_v31  ;;  %v2044_v49 = vld [vmem:[#allocation2 + $0xa0] sm:$0xf]  ;;  %v2831_v50 = vld [vmem:[#allocation2 + $0xb4] sm:$0xf0]  ;;  %v2882_v54 = vld [vmem:[#allocation2 + $0x254] sm:$0xf] }
  0x4c   :  { %745 = vmatpush.bf16.msrb.mxu0 %v2013_v39  ;;  %v2260_v39 = vld [vmem:[#allocation2 + $0x250] sm:$0xf]  ;;  %v2879_v53 = vld [vmem:[#allocation2 + $0x234] sm:$0xf0]  ;;  %v2262_v55 = vld [vmem:[#allocation2 + $0x268] sm:$0xf0]  ;;  %v2045_v58 = vor.u32 %v2831_v50, %v2044_v49 }
  0x4d   :  { %758 = vmatpush.bf16.msrb.mxu1 %v2205_v40  ;;  %v2097_v40 = vor.u32 %v2840_v32, %v2094_v33  ;;  %v2261_v47 = vor.u32 %v2885_v41, %v2260_v39  ;;  %v2046_v57 = vld [vmem:[#allocation2 + $0xb8] sm:$0xf0]  ;;  %v2020_v61 = vld [vmem:[#allocation2 + $0x70] sm:$0xf]  ;;  %v2825_v62 = vld [vmem:[#allocation2 + $0x84] sm:$0xf0] }
  0x4e   :  { %771 = vmatpush.bf16.msrb.mxu2 %v2017_v42  ;;  %v2888_v42 = vld [vmem:[#allocation2 + $0x284] sm:$0xf]  ;;  %v2212_v63 = vld [vmem:[#allocation2 + $0x1f0] sm:$0xf]  ;;  %v2873_v1 = vld [vmem:[#allocation2 + $0x204] sm:$0xf0]  ;;  %v2021_v6 = vor.u32 %v2825_v62, %v2020_v61 }
  0x4f   :  { %784 = vmatpush.bf16.msrb.mxu3 %v2209_v46  ;;  %v2069_v46 = vor.u32 %v2837_v38, %v2068_v37  ;;  %v2289_v48 = vor.u32 %v2888_v42, %v2286_v43  ;;  %v2876_v2 = vld [vmem:[#allocation2 + $0x224] sm:$0xf]  ;;  %v2022_v5 = vld [vmem:[#allocation2 + $0x88] sm:$0xf0]  ;;  %v2188_v13 = vld [vmem:[#allocation2 + $0x1c0] sm:$0xf] }
  0x50   :  { %746 = vmatpush.bf16.msrb.mxu0 %v1989_v51  ;;  %v2236_v51 = vld [vmem:[#allocation2 + $0x220] sm:$0xf]  ;;  %v2867_v15 = vld [vmem:[#allocation2 + $0x1d4] sm:$0xf0]  ;;  %v2214_v17 = vld [vmem:[#allocation2 + $0x208] sm:$0xf0] }
  0x51   :  { %759 = vmatpush.bf16.msrb.mxu1 %v2181_v52  ;;  %v2073_v52 = vor.u32 %v2834_v44, %v2070_v45  ;;  %v2237_v59 = vor.u32 %v2879_v53, %v2236_v51  ;;  %v2816_v18 = vld [vmem:[#allocation2 + $0x44] sm:$0xf]  ;;  %v1998_v19 = vld [vmem:[#allocation2 + $0x58] sm:$0xf0]  ;;  %v1972_v21 = vld [vmem:[#allocation2 + $0x10] sm:$0xf] }
  0x52   :  { %772 = vmatpush.bf16.msrb.mxu2 %v1993_v56  ;;  %v2828_v56 = vld [vmem:[#allocation2 + $0xa4] sm:$0xf]  ;;  %v2164_v25 = vld [vmem:[#allocation2 + $0x190] sm:$0xf]  ;;  %v2861_v26 = vld [vmem:[#allocation2 + $0x1a4] sm:$0xf0]  ;;  %v2001_v27 = vor.u32 %v2816_v18, %v1998_v19 }
  0x53   :  { %785 = vmatpush.bf16.msrb.mxu3 %v2185_v60  ;;  %v2265_v60 = vor.u32 %v2882_v54, %v2262_v55  ;;  %v2049_v0 = vor.u32 %v2828_v56, %v2046_v57  ;;  %v2190_v29 = vld [vmem:[#allocation2 + $0x1d8] sm:$0xf0]  ;;  %v2810_v30 = vld [vmem:[#allocation2 + $0x14] sm:$0xf]  ;;  %v1974_v31 = vld [vmem:[#allocation2 + $0x28] sm:$0xf0]  ;;  %v2165_v37 = vor.u32 %v2861_v26, %v2164_v25 }
  0x54   :  { %747 = vmatpush.bf16.msrb.mxu0 %v1965_v3  ;;  %v2238_v3 = vld [vmem:[#allocation2 + $0x238] sm:$0xf0]  ;;  %v2460_v32 = vld [vmem:[#allocation5 + $0xf0] sm:$0xf]  ;;  %v2935_v33 = vld [vmem:[#allocation5 + $0xf4] sm:$0xf0]  ;;  %v1977_v41 = vor.u32 %v2810_v30, %v1974_v31 }
  0x55   :  { %760 = vmatpush.bf16.msrb.mxu1 %v2157_v4  ;;  %v2822_v4 = vld [vmem:[#allocation2 + $0x74] sm:$0xf]  ;;  %v2396_v39 = vld [vmem:[#allocation5 + $0x70] sm:$0xf]  ;;  %v2166_v43 = vld [vmem:[#allocation2 + $0x1a8] sm:$0xf0]  ;;  %v2461_v44 = vor.u32 %v2935_v33, %v2460_v32 }
  0x56   :  { %773 = vmatpush.bf16.msrb.mxu2 %v1969_v7  ;;  %v2213_v7 = vor.u32 %v2873_v1, %v2212_v63  ;;  %v2025_v14 = vor.u32 %v2822_v4, %v2022_v5  ;;  %v2858_v42 = vld [vmem:[#allocation2 + $0x194] sm:$0xf]  ;;  %v2452_v45 = vld [vmem:[#allocation5 + $0xe0] sm:$0xf]  ;;  %v2967_v49 = vld [vmem:[#allocation5 + $0x1f4] sm:$0xf0] }
  0x57   :  { %786 = vmatpush.bf16.msrb.mxu3 %v2161_v10  ;;  %748 = vmatmul.bf16.vlgmr.msrb.gmra.mxu0 %v3229_v11  ;;  %v2819_v10 = vld [vmem:[#allocation2 + $0x54] sm:$0xf0]  ;;  %v2516_v50 = vld [vmem:[#allocation5 + $0x160] sm:$0xf]  ;;  %v2949_v51 = vld [vmem:[#allocation5 + $0x164] sm:$0xf0]  ;;  %v2169_v53 = vor.u32 %v2858_v42, %v2166_v43 }
  0x58   :  { %792 = vmatpush.bf16.msra.mxu0 %v2141_v8  ;;  %761 = vmatmul.bf16.vlgmr.msrb.gmra.mxu1 %v3231_v12  ;;  %v2241_v8 = vor.u32 %v2876_v2, %v2238_v3  ;;  %v2388_v54 = vld [vmem:[#allocation5 + $0x60] sm:$0xf]  ;;  %v2917_v55 = vld [vmem:[#allocation5 + $0x64] sm:$0xf0]  ;;  %v2444_v57 = vld [vmem:[#allocation5 + $0xd0] sm:$0xf] }
  0x59   :  { %805 = vmatpush.bf16.msra.mxu1 %v2333_v9  ;;  %774 = vmatmul.bf16.vlgmr.msrb.gmra.mxu2 %v3229_v11  ;;  %v1996_v9 = vld [vmem:[#allocation2 + $0x40] sm:$0xf]  ;;  %v2965_v62 = vld [vmem:[#allocation5 + $0x1e4] sm:$0xf0]  ;;  %v2508_v63 = vld [vmem:[#allocation5 + $0x150] sm:$0xf]  ;;  %v2389_v1 = vor.u32 %v2917_v55, %v2388_v54 }
  0x5a   :  { %818 = vmatpush.bf16.msra.mxu2 %v2145_v16  ;;  %787 = vmatmul.bf16.vlgmr.msrb.gmra.mxu3 %v3231_v12  ;;  %v2870_v16 = vld [vmem:[#allocation2 + $0x1f4] sm:$0xf]  ;;  %v1997_v20 = vor.u32 %v2819_v10, %v1996_v9  ;;  %v2580_v61 = vld [vmem:[#allocation5 + $0x1e0] sm:$0xf]  ;;  %v2380_v2 = vld [vmem:[#allocation5 + $0x50] sm:$0xf] }
  0x5b   :  { %831 = vmatpush.bf16.msra.mxu3 %v2337_v24  ;;  %v2813_v24 = vld [vmem:[#allocation2 + $0x24] sm:$0xf0]  ;;  %v2915_v3 = vld [vmem:[#allocation5 + $0x54] sm:$0xf0]  ;;  %v2436_v5 = vld [vmem:[#allocation5 + $0xc0] sm:$0xf] }
  0x5c   :  { %793 = vmatpush.bf16.msra.mxu0 %v2117_v22  ;;  %v2189_v22 = vor.u32 %v2867_v15, %v2188_v13  ;;  %v2572_v9 = vld [vmem:[#allocation5 + $0x1d0] sm:$0xf]  ;;  %v2963_v10 = vld [vmem:[#allocation5 + $0x1d4] sm:$0xf0]  ;;  %v2500_v13 = vld [vmem:[#allocation5 + $0x140] sm:$0xf]  ;;  %v2381_v15 = vor.u32 %v2915_v3, %v2380_v2 }
  0x5d   :  { %806 = vmatpush.bf16.msra.mxu1 %v2309_v23  ;;  %v2217_v23 = vor.u32 %v2870_v16, %v2214_v17  ;;  %v2372_v16 = vld [vmem:[#allocation5 + $0x40] sm:$0xf]  ;;  %v2428_v18 = vld [vmem:[#allocation5 + $0xb0] sm:$0xf]  ;;  %v2573_v19 = vor.u32 %v2963_v10, %v2572_v9  ;;  %v2943_v25 = vld [vmem:[#allocation5 + $0x134] sm:$0xf0] }
  0x5e   :  { %819 = vmatpush.bf16.msra.mxu2 %v2121_v28  ;;  %v2864_v28 = vld [vmem:[#allocation2 + $0x1c4] sm:$0xf]  ;;  %v2364_v26 = vld [vmem:[#allocation5 + $0x30] sm:$0xf]  ;;  %v2420_v31 = vld [vmem:[#allocation5 + $0xa0] sm:$0xf] }
  0x5f   :  { %832 = vmatpush.bf16.msra.mxu3 %v2313_v36  ;;  %v2951_v36 = vld [vmem:[#allocation5 + $0x174] sm:$0xf0]  ;;  %v2193_v38 = vor.u32 %v2864_v28, %v2190_v29  ;;  %v2925_v32 = vld [vmem:[#allocation5 + $0xa4] sm:$0xf0]  ;;  %v2484_v33 = vld [vmem:[#allocation5 + $0x120] sm:$0xf] }
  0x60   :  { %794 = vmatpush.bf16.msra.mxu0 %v2093_v34  ;;  %v1973_v34 = vor.u32 %v2813_v24, %v1972_v21  ;;  %v2927_v21 = vld [vmem:[#allocation5 + $0xb4] sm:$0xf0]  ;;  %v2492_v24 = vld [vmem:[#allocation5 + $0x130] sm:$0xf]  ;;  %v2548_v9 = vld [vmem:[#allocation5 + $0x1a0] sm:$0xf] }
  0x61   :  { %807 = vmatpush.bf16.msra.mxu1 %v2285_v35  ;;  %v2524_v35 = vld [vmem:[#allocation5 + $0x170] sm:$0xf]  ;;  %v2429_v28 = vor.u32 %v2927_v21, %v2428_v18  ;;  %v2493_v30 = vor.u32 %v2943_v25, %v2492_v24  ;;  %v2374_v18 = vld [vmem:[#allocation5 + $0x48] sm:$0xf0]  ;;  %v2905_v21 = vld [vmem:[#allocation5 + $0x4] sm:$0xf0] }
  0x62   :  { %820 = vmatpush.bf16.msra.mxu2 %v2097_v40  ;;  %v2919_v40 = vld [vmem:[#allocation5 + $0x74] sm:$0xf0]  ;;  %vm1372_vm0 = vcmask 392192   ;;  %vm1532_vm1 = vcmask 1043456   ;;  %vm1540_vm3 = vcmask 257024   ;;  %vm1689_vm4 = vcmask 261120  }
  0x63   :  { %833 = vmatpush.bf16.msra.mxu3 %v2289_v48  ;;  %v2588_v48 = vld [vmem:[#allocation5 + $0x1f0] sm:$0xf]  ;;  %s3173_s27 = smov [#allocation10]   ;;  %s1942_s8 = sshll.u32 %s3311_s7, 4  ;;  %s1943_s8 = int_to_ptr.hbm [resolvable:$true] %s1942_s8 }
  0x64   :  { %795 = vmatpush.bf16.msra.mxu0 %v2069_v46  ;;  %v2525_v46 = vor.u32 %v2951_v36, %v2524_v35  ;;  %v2421_v36 = vor.u32 %v2925_v32, %v2420_v31  ;;  %v2953_v31 = vld [vmem:[#allocation5 + $0x184] sm:$0xf0]  ;;  %s1940_s28 = sshll.u32 %s3173_s27, 4  ;;  %s1941_s28 = int_to_ptr.vmem [resolvable:$true] %s1940_s28 }
  0x65   :  { %808 = vmatpush.bf16.msra.mxu1 %v2261_v47  ;;  %v2933_v47 = vld [vmem:[#allocation5 + $0xe4] sm:$0xf0] }
  0x66   :  { %821 = vmatpush.bf16.msra.mxu2 %v2073_v52  ;;  %v2397_v52 = vor.u32 %v2919_v40, %v2396_v39  ;;  %v2453_v56 = vor.u32 %v2933_v47, %v2452_v45  ;;  %v2923_v39 = vld [vmem:[#allocation5 + $0x94] sm:$0xf0]  ;;  %v2476_v40 = vld [vmem:[#allocation5 + $0x110] sm:$0xf]  ;;  %v2404_v45 = vld [vmem:[#allocation5 + $0x80] sm:$0xf] }
  0x67   :  { %834 = vmatpush.bf16.msra.mxu3 %v2265_v60  ;;  %v2931_v60 = vld [vmem:[#allocation5 + $0xd4] sm:$0xf0]  ;;  %v2937_v47 = vld [vmem:[#allocation5 + $0x104] sm:$0xf0] }
  0x68   :  { %796 = vmatpush.bf16.msra.mxu0 %v2045_v58  ;;  %v2589_v58 = vor.u32 %v2967_v49, %v2588_v48  ;;  %v2445_v4 = vor.u32 %v2931_v60, %v2444_v57  ;;  %v2950_v48 = vld [vmem:[#allocation5 + $0x174] sm:$0xf]  ;;  %v2526_v49 = vld [vmem:[#allocation5 + $0x178] sm:$0xf0]  ;;  %v2390_v57 = vld [vmem:[#allocation5 + $0x68] sm:$0xf0] }
  0x69   :  { %809 = vmatpush.bf16.msra.mxu1 %v2237_v59  ;;  %v2517_v59 = vor.u32 %v2949_v51, %v2516_v50  ;;  %v2918_v50 = vld [vmem:[#allocation5 + $0x74] sm:$0xf]  ;;  %v2398_v51 = vld [vmem:[#allocation5 + $0x78] sm:$0xf0]  ;;  %v2529_v54 = vor.u32 %v2950_v48, %v2526_v49  ;;  %v2909_v60 = vld [vmem:[#allocation5 + $0x24] sm:$0xf0] }
  0x6a   :  { %822 = vmatpush.bf16.msra.mxu2 %v2049_v0  ;;  %v2947_v0 = vld [vmem:[#allocation5 + $0x154] sm:$0xf0]  ;;  %v2401_v55 = vor.u32 %v2918_v50, %v2398_v51  ;;  %v2932_v50 = vld [vmem:[#allocation5 + $0xe4] sm:$0xf]  ;;  %v2454_v51 = vld [vmem:[#allocation5 + $0xe8] sm:$0xf0] }
  0x6b   :  { %835 = vmatpush.bf16.msra.mxu3 %v2241_v8  ;;  %v2929_v8 = vld [vmem:[#allocation5 + $0xc4] sm:$0xf0]  ;;  %v3248_v48 = vld [vmem:[%s3306_s2] sm:$0x3f] }
  0x6c   :  { %797 = vmatpush.bf16.msra.mxu0 %v2021_v6  ;;  %v2581_v6 = vor.u32 %v2965_v62, %v2580_v61  ;;  %v2437_v17 = vor.u32 %v2929_v8, %v2436_v5  ;;  %v2556_v61 = vld [vmem:[#allocation5 + $0x1b0] sm:$0xf]  ;;  %v2382_v5 = vld [vmem:[#allocation5 + $0x58] sm:$0xf0]  ;;  %v2907_v8 = vld [vmem:[#allocation5 + $0x14] sm:$0xf0] }
  0x6d   :  { %810 = vmatpush.bf16.msra.mxu1 %v2213_v7  ;;  %v2509_v7 = vor.u32 %v2947_v0, %v2508_v63  ;;  %v2959_v63 = vld [vmem:[#allocation5 + $0x1b4] sm:$0xf0]  ;;  %v2948_v0 = vld [vmem:[#allocation5 + $0x164] sm:$0xf] }
  0x6e   :  { %823 = vmatpush.bf16.msra.mxu2 %v2025_v14  ;;  %v2945_v14 = vld [vmem:[#allocation5 + $0x144] sm:$0xf0]  ;;  %v2557_v2 = vor.u32 %v2959_v63, %v2556_v61  ;;  %v2478_v61 = vld [vmem:[#allocation5 + $0x118] sm:$0xf0]  ;;  %v2930_v63 = vld [vmem:[#allocation5 + $0xd4] sm:$0xf] }
  0x6f   :  { %836 = vmatpush.bf16.msra.mxu3 %v2217_v23  ;;  %v2961_v23 = vld [vmem:[#allocation5 + $0x1c4] sm:$0xf0] }
  0x70   :  { %798 = vmatpush.bf16.msra.mxu0 %v1997_v20  ;;  %v2501_v20 = vor.u32 %v2945_v14, %v2500_v13  ;;  %v2957_v13 = vld [vmem:[#allocation5 + $0x1a4] sm:$0xf0]  ;;  %v2946_v14 = vld [vmem:[#allocation5 + $0x154] sm:$0xf] }
  0x71   :  { %811 = vmatpush.bf16.msra.mxu1 %v2189_v22  ;;  %v2564_v22 = vld [vmem:[#allocation5 + $0x1c0] sm:$0xf] }
  0x72   :  { %824 = vmatpush.bf16.msra.mxu2 %v2001_v27  ;;  %v2911_v27 = vld [vmem:[#allocation5 + $0x34] sm:$0xf0]  ;;  %v2565_v29 = vor.u32 %v2961_v23, %v2564_v22  ;;  %v2540_v22 = vld [vmem:[#allocation5 + $0x190] sm:$0xf] }
  0x73   :  { %837 = vmatpush.bf16.msra.mxu3 %v2193_v38  ;;  %v2365_v35 = vor.u32 %v2911_v27, %v2364_v26  ;;  %v2412_v38 = vld [vmem:[#allocation5 + $0x90] sm:$0xf]  ;;  %v2955_v23 = vld [vmem:[#allocation5 + $0x194] sm:$0xf0]  ;;  %v2502_v26 = vld [vmem:[#allocation5 + $0x148] sm:$0xf0] }
  0x74   :  { %799 = vmatpush.bf16.msra.mxu0 %v1973_v34  ;;  %v2941_v34 = vld [vmem:[#allocation5 + $0x124] sm:$0xf0]  ;;  %v2413_v42 = vor.u32 %v2923_v39, %v2412_v38  ;;  %v2541_v25 = vor.u32 %v2955_v23, %v2540_v22  ;;  %v2910_v27 = vld [vmem:[#allocation5 + $0x34] sm:$0xf]  ;;  %v2462_v38 = vld [vmem:[#allocation5 + $0xf8] sm:$0xf0] }
  0x75   :  { %812 = vmatpush.bf16.msra.mxu1 %v2165_v37  ;;  %v2485_v37 = vor.u32 %v2941_v34, %v2484_v33  ;;  %v2942_v33 = vld [vmem:[#allocation5 + $0x134] sm:$0xf]  ;;  %v2494_v34 = vld [vmem:[#allocation5 + $0x138] sm:$0xf0] }
  0x76   :  { %825 = vmatpush.bf16.msra.mxu2 %v1977_v41  ;;  %v2939_v41 = vld [vmem:[#allocation5 + $0x114] sm:$0xf0] }
  0x77   :  { %800 = vmatmul.bf16.vlgmr.msra.gmra.mxu0 %v3229_v11  ;;  %838 = vmatpush.bf16.msra.mxu3 %v2169_v53  ;;  %v2477_v43 = vor.u32 %v2939_v41, %v2476_v40  ;;  %v2652_v40 = vld [vmem:[#allocation5 + $0x270] sm:$0xf]  ;;  %v2983_v41 = vld [vmem:[#allocation5 + $0x274] sm:$0xf0] }
  0x78   :  { %813 = vmatmul.bf16.vlgmr.msra.gmra.mxu1 %v3231_v12  ;;  %1376 = vmatpush.bf16.msrb.mxu0 %v2397_v52 }
  0x79   :  { %1389 = vmatpush.bf16.msrb.mxu1 %v2461_v44  ;;  %826 = vmatmul.bf16.vlgmr.msra.gmra.mxu2 %v3229_v11  ;;  %v2913_v11 = vld [vmem:[#allocation5 + $0x44] sm:$0xf0]  ;;  %v2468_v44 = vld [vmem:[#allocation5 + $0x100] sm:$0xf] }
  0x7a   :  { %1402 = vmatpush.bf16.msrb.mxu2 %v2525_v46  ;;  %839 = vmatmul.bf16.vlgmr.msra.gmra.mxu3 %v3231_v12  ;;  %v2373_v12 = vor.u32 %v2913_v11, %v2372_v16  ;;  %v2921_v46 = vld [vmem:[#allocation5 + $0x84] sm:$0xf0]  ;;  %v2469_v53 = vor.u32 %v2937_v47, %v2468_v44  ;;  %v2549_v16 = vor.u32 %v2957_v13, %v2548_v9  ;;  %v2358_v44 = vld [vmem:[#allocation5 + $0x28] sm:$0xf0] }
  0x7b   :  { %1415 = vmatpush.bf16.msrb.mxu3 %v2589_v58  ;;  %v2405_v52 = vor.u32 %v2921_v46, %v2404_v45  ;;  %v2940_v46 = vld [vmem:[#allocation5 + $0x124] sm:$0xf]  ;;  %v2486_v47 = vld [vmem:[#allocation5 + $0x128] sm:$0xf0] }
  0x7c   :  { %1377 = vmatpush.bf16.msrb.mxu0 %v2389_v1  ;;  %v2518_v1 = vld [vmem:[#allocation5 + $0x168] sm:$0xf0]  ;;  %v2489_v49 = vor.u32 %v2940_v46, %v2486_v47  ;;  %v2414_v46 = vld [vmem:[#allocation5 + $0x98] sm:$0xf0]  ;;  %v2604_v47 = vld [vmem:[#allocation5 + $0x210] sm:$0xf] }
  0x7d   :  { %1390 = vmatpush.bf16.msrb.mxu1 %v2453_v56  ;;  %v2916_v56 = vld [vmem:[#allocation5 + $0x64] sm:$0xf]  ;;  %v2521_v3 = vor.u32 %v2948_v0, %v2518_v1  ;;  %v2446_v0 = vld [vmem:[#allocation5 + $0xd8] sm:$0xf0]  ;;  %v2470_v13 = vld [vmem:[#allocation5 + $0x108] sm:$0xf0] }
  0x7e   :  { %1403 = vmatpush.bf16.msrb.mxu2 %v2517_v59  ;;  %v2393_v58 = vor.u32 %v2916_v56, %v2390_v57  ;;  %v2356_v59 = vld [vmem:[#allocation5 + $0x20] sm:$0xf]  ;;  %v2350_v57 = vld [vmem:[#allocation5 + $0x18] sm:$0xf0]  ;;  %v2449_v1 = vor.u32 %v2930_v63, %v2446_v0  ;;  %v2668_v0 = vld [vmem:[#allocation5 + $0x290] sm:$0xf] }
  0x7f   :  { %1416 = vmatpush.bf16.msrb.mxu3 %v2581_v6  ;;  %v2357_v62 = vor.u32 %v2909_v60, %v2356_v59  ;;  %v2938_v60 = vld [vmem:[#allocation5 + $0x114] sm:$0xf] }
  0x80   :  { %1378 = vmatpush.bf16.msrb.mxu0 %v2381_v15  ;;  %v2510_v15 = vld [vmem:[#allocation5 + $0x158] sm:$0xf0] }
  0x81   :  { %1391 = vmatpush.bf16.msrb.mxu1 %v2445_v4  ;;  %v2914_v4 = vld [vmem:[#allocation5 + $0x54] sm:$0xf]  ;;  %v2513_v11 = vor.u32 %v2946_v14, %v2510_v15  ;;  %v2928_v15 = vld [vmem:[#allocation5 + $0xc4] sm:$0xf] }
  0x82   :  { %1404 = vmatpush.bf16.msrb.mxu2 %v2509_v7  ;;  %v2385_v6 = vor.u32 %v2914_v4, %v2382_v5  ;;  %v2348_v7 = vld [vmem:[#allocation5 + $0x10] sm:$0xf]  ;;  %v2904_v4 = vld [vmem:[#allocation5 + $0x4] sm:$0xf] }
  0x83   :  { %1417 = vmatpush.bf16.msrb.mxu3 %v2573_v19  ;;  %v2349_v10 = vor.u32 %v2907_v8, %v2348_v7  ;;  %v2340_v19 = vld [vmem:[#allocation5] sm:$0xf]  ;;  %v2342_v7 = vld [vmem:[#allocation5 + $0x8] sm:$0xf0] }
  0x84   :  { %1379 = vmatpush.bf16.msrb.mxu0 %v2373_v12  ;;  %v2341_v24 = vor.u32 %v2905_v21, %v2340_v19  ;;  %v2944_v12 = vld [vmem:[#allocation5 + $0x144] sm:$0xf]  ;;  %v2345_v9 = vor.u32 %v2904_v4, %v2342_v7  ;;  %v2628_v19 = vld [vmem:[#allocation5 + $0x240] sm:$0xf]  ;;  %v2654_v7 = vld [vmem:[#allocation5 + $0x278] sm:$0xf0] }
  0x85   :  { %1392 = vmatpush.bf16.msrb.mxu1 %v2437_v17  ;;  %v2912_v17 = vld [vmem:[#allocation5 + $0x44] sm:$0xf] }
  0x86   :  { %1405 = vmatpush.bf16.msrb.mxu2 %v2501_v20  ;;  %v2377_v20 = vor.u32 %v2912_v17, %v2374_v18  ;;  %v191_v17 = vperm.slane %v3248_v48, 1 }
  0x87   :  { %1418 = vmatpush.bf16.msrb.mxu3 %v2565_v29  ;;  %v2366_v29 = vld [vmem:[#allocation5 + $0x38] sm:$0xf0] }
  0x88   :  { %1380 = vmatpush.bf16.msrb.mxu0 %v2365_v35  ;;  %v2369_v32 = vor.u32 %v2910_v27, %v2366_v29  ;;  %v2975_v29 = vld [vmem:[#allocation5 + $0x234] sm:$0xf0] }
  0x89   :  { %1393 = vmatpush.bf16.msrb.mxu1 %v2429_v28  ;;  %v2505_v28 = vor.u32 %v2944_v12, %v2502_v26  ;;  %v2430_v12 = vld [vmem:[#allocation5 + $0xb8] sm:$0xf0] }
  0x8a   :  { %1406 = vmatpush.bf16.msrb.mxu2 %v2493_v30  ;;  %v2532_v30 = vld [vmem:[#allocation5 + $0x180] sm:$0xf] }
  0x8b   :  { %1419 = vmatpush.bf16.msrb.mxu3 %v2557_v2  ;;  %v2533_v35 = vor.u32 %v2953_v31, %v2532_v30  ;;  %v2636_v2 = vld [vmem:[#allocation5 + $0x250] sm:$0xf] }
  0x8c   :  { %1381 = vmatpush.bf16.msrb.mxu0 %v2357_v62  ;;  %v2481_v62 = vor.u32 %v2938_v60, %v2478_v61  ;;  %v2989_v60 = vld [vmem:[#allocation5 + $0x2a4] sm:$0xf0]  ;;  %v192_v61 = vperm.slane %v3248_v48, 2 }
  0x8d   :  { %1394 = vmatpush.bf16.msrb.mxu1 %v2421_v36  ;;  %v2497_v36 = vor.u32 %v2942_v33, %v2494_v34 }
  0x8e   :  { %1407 = vmatpush.bf16.msrb.mxu2 %v2485_v37  ;;  %v2934_v37 = vld [vmem:[#allocation5 + $0xf4] sm:$0xf] }
  0x8f   :  { %1420 = vmatpush.bf16.msrb.mxu3 %v2549_v16  ;;  %v2465_v39 = vor.u32 %v2934_v37, %v2462_v38  ;;  %v2438_v16 = vld [vmem:[#allocation5 + $0xc8] sm:$0xf0]  ;;  %v2612_v37 = vld [vmem:[#allocation5 + $0x220] sm:$0xf] }
  0x90   :  { %1382 = vmatpush.bf16.msrb.mxu0 %v2349_v10  ;;  %v2936_v10 = vld [vmem:[#allocation5 + $0x104] sm:$0xf]  ;;  %v2441_v18 = vor.u32 %v2928_v15, %v2438_v16 }
  0x91   :  { %1395 = vmatpush.bf16.msrb.mxu1 %v2413_v42  ;;  %v2908_v42 = vld [vmem:[#allocation5 + $0x24] sm:$0xf]  ;;  %v2473_v14 = vor.u32 %v2936_v10, %v2470_v13  ;;  %v2985_v10 = vld [vmem:[#allocation5 + $0x284] sm:$0xf0] }
  0x92   :  { %1408 = vmatpush.bf16.msrb.mxu2 %v2477_v43  ;;  %v2653_v43 = vor.u32 %v2983_v41, %v2652_v40  ;;  %v2361_v45 = vor.u32 %v2908_v42, %v2358_v44  ;;  %v2973_v41 = vld [vmem:[#allocation5 + $0x224] sm:$0xf0] }
  0x93   :  { %1421 = vmatpush.bf16.msrb.mxu3 %v2541_v25  ;;  %v2926_v25 = vld [vmem:[#allocation5 + $0xb4] sm:$0xf]  ;;  %v2613_v42 = vor.u32 %v2973_v41, %v2612_v37  ;;  %v2984_v41 = vld [vmem:[#allocation5 + $0x284] sm:$0xf] }
  0x94   :  { %1383 = vmatpush.bf16.msrb.mxu0 %v2341_v24  ;;  %v2433_v27 = vor.u32 %v2926_v25, %v2430_v12  ;;  %v2988_v25 = vld [vmem:[#allocation5 + $0x2a4] sm:$0xf]  ;;  %v2678_v12 = vld [vmem:[#allocation5 + $0x2a8] sm:$0xf0] }
  0x95   :  { %1396 = vmatpush.bf16.msrb.mxu1 %v2405_v52  ;;  %v2457_v52 = vor.u32 %v2932_v50, %v2454_v51  ;;  %v2971_v50 = vld [vmem:[#allocation5 + $0x214] sm:$0xf0] }
  0x96   :  { %1409 = vmatpush.bf16.msrb.mxu2 %v2469_v53  ;;  %v2644_v53 = vld [vmem:[#allocation5 + $0x260] sm:$0xf] }
  0x97   :  { %1422 = vmatpush.bf16.msrb.mxu3 %v2533_v35  ;;  %v2924_v35 = vld [vmem:[#allocation5 + $0xa4] sm:$0xf] }
  0x98   :  { %1428 = vmatpush.bf16.msra.mxu0 %v2653_v43 }
  0x99   :  { %1480 = vmatpush.bf16.msra.mxu1 %v2529_v54  ;;  %v2981_v54 = vld [vmem:[#allocation5 + $0x264] sm:$0xf0] }
  0x9a   :  { %1454 = vmatpush.bf16.msra.mxu2 %v2401_v55  ;;  %v2906_v55 = vld [vmem:[#allocation5 + $0x14] sm:$0xf]  ;;  %v2645_v56 = vor.u32 %v2981_v54, %v2644_v53  ;;  %v2920_v53 = vld [vmem:[#allocation5 + $0x84] sm:$0xf]  ;;  %v2406_v54 = vld [vmem:[#allocation5 + $0x88] sm:$0xf0] }
  0x9b   :  { %1467 = vmatpush.bf16.msra.mxu3 %v2465_v39  ;;  %v2353_v59 = vor.u32 %v2906_v55, %v2350_v57  ;;  %v2409_v55 = vor.u32 %v2920_v53, %v2406_v54  ;;  %v2969_v57 = vld [vmem:[#allocation5 + $0x204] sm:$0xf0]  ;;  %v2970_v53 = vld [vmem:[#allocation5 + $0x214] sm:$0xf]  ;;  %v2606_v54 = vld [vmem:[#allocation5 + $0x218] sm:$0xf0] }
  0x9c   :  { %1429 = vmatpush.bf16.msra.mxu0 %v2645_v56  ;;  %v2596_v56 = vld [vmem:[#allocation5 + $0x200] sm:$0xf] }
  0x9d   :  { %1481 = vmatpush.bf16.msra.mxu1 %v2521_v3  ;;  %v2979_v3 = vld [vmem:[#allocation5 + $0x254] sm:$0xf0] }
  0x9e   :  { %1455 = vmatpush.bf16.msra.mxu2 %v2393_v58  ;;  %v190_v58 = vperm.slane %v3248_v48, 0 }
  0x9f   :  { %1468 = vmatpush.bf16.msra.mxu3 %v2457_v52  ;;  %v2605_v52 = vor.u32 %v2971_v50, %v2604_v47  ;;  %v2614_v50 = vld [vmem:[#allocation5 + $0x228] sm:$0xf0] }
  0xa1   :  { %1482 = vmatpush.bf16.msra.mxu1 %v2513_v11 }
  0xa2   :  { %1456 = vmatpush.bf16.msra.mxu2 %v2385_v6  ;;  %v2637_v6 = vor.u32 %v2979_v3, %v2636_v2 }
  0xa3   :  { %1469 = vmatpush.bf16.msra.mxu3 %v2449_v1  ;;  %v2987_v1 = vld [vmem:[#allocation5 + $0x294] sm:$0xf0] }
  0xa4   :  { %1430 = vmatpush.bf16.msra.mxu0 %v2637_v6  ;;  %v2669_v4 = vor.u32 %v2987_v1, %v2668_v0  ;;  %v2982_v6 = vld [vmem:[#allocation5 + $0x274] sm:$0xf]  ;;  %v195_v0 = vperm.slane %v3248_v48, 5 }
  0xa5   :  { %1483 = vmatpush.bf16.msra.mxu1 %v2505_v28  ;;  %v2620_v28 = vld [vmem:[#allocation5 + $0x230] sm:$0xf]  ;;  %v2657_v15 = vor.u32 %v2982_v6, %v2654_v7 }
  0xa6   :  { %1457 = vmatpush.bf16.msra.mxu2 %v2377_v20  ;;  %v2977_v20 = vld [vmem:[#allocation5 + $0x244] sm:$0xf0]  ;;  %v2621_v33 = vor.u32 %v2975_v29, %v2620_v28  ;;  %v2681_v29 = vor.u32 %v2988_v25, %v2678_v12  ;;  %v2956_v25 = vld [vmem:[#allocation5 + $0x1a4] sm:$0xf]  ;;  %v2550_v12 = vld [vmem:[#allocation5 + $0x1a8] sm:$0xf0] }
  0xa7   :  { %v2629_v22 = vor.u32 %v2977_v20, %v2628_v19  ;;  %1470 = vmatpush.bf16.msra.mxu3 %v2441_v18  ;;  %v2646_v18 = vld [vmem:[#allocation5 + $0x268] sm:$0xf0] }
  0xa9   :  { %1484 = vmatpush.bf16.msra.mxu1 %v2497_v36  ;;  %1431 = vmatpush.bf16.msra.mxu0 %v2629_v22  ;;  %v2422_v36 = vld [vmem:[#allocation5 + $0xa8] sm:$0xf0] }
  0xaa   :  { %1458 = vmatpush.bf16.msra.mxu2 %v2369_v32  ;;  %v2425_v40 = vor.u32 %v2924_v35, %v2422_v36  ;;  %v2976_v35 = vld [vmem:[#allocation5 + $0x244] sm:$0xf]  ;;  %v2630_v36 = vld [vmem:[#allocation5 + $0x248] sm:$0xf0] }
  0xab   :  { %1471 = vmatpush.bf16.msra.mxu3 %v2433_v27  ;;  %v2638_v27 = vld [vmem:[#allocation5 + $0x258] sm:$0xf0] }
  0xad   :  { %1485 = vmatpush.bf16.msra.mxu1 %v2489_v49  ;;  %1432 = vmatpush.bf16.msra.mxu0 %v2621_v33  ;;  %v2986_v33 = vld [vmem:[#allocation5 + $0x294] sm:$0xf] }
  0xae   :  { %1459 = vmatpush.bf16.msra.mxu2 %v2361_v45  ;;  %v2922_v45 = vld [vmem:[#allocation5 + $0x94] sm:$0xf] }
  0xaf   :  { %1472 = vmatpush.bf16.msra.mxu3 %v2425_v40  ;;  %v2417_v49 = vor.u32 %v2922_v45, %v2414_v46  ;;  %v2633_v40 = vor.u32 %v2976_v35, %v2630_v36  ;;  %v2622_v45 = vld [vmem:[#allocation5 + $0x238] sm:$0xf0] }
  0xb1   :  { %1486 = vmatpush.bf16.msra.mxu1 %v2481_v62  ;;  %1433 = vmatpush.bf16.msra.mxu0 %v2613_v42  ;;  %v2662_v42 = vld [vmem:[#allocation5 + $0x288] sm:$0xf0] }
  0xb2   :  { %1460 = vmatpush.bf16.msra.mxu2 %v2353_v59  ;;  %v2676_v59 = vld [vmem:[#allocation5 + $0x2a0] sm:$0xf]  ;;  %v2665_v46 = vor.u32 %v2984_v41, %v2662_v42  ;;  %v3004_v41 = vld [vmem:[#allocation7 + $0x74] sm:$0xf] }
  0xb3   :  { %1473 = vmatpush.bf16.msra.mxu3 %v2417_v49  ;;  %v2677_v62 = vor.u32 %v2989_v60, %v2676_v59  ;;  %v2972_v49 = vld [vmem:[#allocation5 + $0x224] sm:$0xf]  ;;  %v2598_v60 = vld [vmem:[#allocation5 + $0x208] sm:$0xf0] }
  0xb4   :  { %v2968_v59 = vld [vmem:[#allocation5 + $0x204] sm:$0xf] }
  0xb5   :  { %v710_v11 = vpop.f32.mrf.mxu1  ;;  %1487 = vmatpush.bf16.msra.mxu1 %v2473_v14  ;;  %1434 = vmatpush.bf16.msra.mxu0 %v2605_v52  ;;  %v2617_v52 = vor.u32 %v2972_v49, %v2614_v50  ;;  %v2601_v1 = vor.u32 %v2968_v59, %v2598_v60  ;;  %v3003_v49 = vld [vmem:[#allocation7 + $0x64] sm:$0xf0]  ;;  %v3002_v50 = vld [vmem:[#allocation7 + $0x64] sm:$0xf] }
  0xb6   :  { %1461 = vmatpush.bf16.msra.mxu2 %v2345_v9  ;;  %v2660_v9 = vld [vmem:[#allocation5 + $0x280] sm:$0xf] }
  0xb7   :  { %v697_v5 = vpop.f32.mrf.mxu0  ;;  %1474 = vmatpush.bf16.msra.mxu3 %v2409_v55  ;;  %v2661_v14 = vor.u32 %v2985_v10, %v2660_v9 }
  0xb8   :  { %v698_v8 = vadd.f32 %v697_v5, %v190_v58  ;;  %v2597_v58 = vor.u32 %v2969_v57, %v2596_v56 }
  0xba   :  { %v711_v21 = vadd.f32 %v710_v11, %v698_v8  ;;  %1435 = vmatpush.bf16.msra.mxu0 %v2597_v58  ;;  %v193_v8 = vperm.slane %v3248_v48, 3  ;;  %v2609_v58 = vor.u32 %v2970_v53, %v2606_v54  ;;  %v2726_v54 = vld [vmem:[#allocation7 + $0x50] sm:$0xf] }
  0xbc   :  { %v844_v23 = vmax.f32 %v711_v21, 0.0  ;;  %v723_v24 = vpop.f32.mrf.mxu2 }
  0xbd   :  { %v724_v26 = vadd.f32 %v723_v24, %v191_v17  ;;  %v712_v39 = vpop.f32.mrf.mxu1  ;;  %v2980_v17 = vld [vmem:[#allocation5 + $0x264] sm:$0xf] }
  0xbe   :  { %v3252_v30 = vpack.c.bf16 %v844_v23, %v844_v23  ;;  %v2649_v24 = vor.u32 %v2980_v17, %v2646_v18  ;;  %v2566_v17 = vld [vmem:[#allocation5 + $0x1c8] sm:$0xf0] }
  0xbf   :  { %v736_v31 = vpop.f32.mrf.mxu3  ;;  %v699_v32 = vpop.f32.mrf.mxu0 }
  0xc0   :  { %v737_v34 = vadd.f32 %v736_v31, %v724_v26  ;;  %1384 = vmatmul.bf16.vlgmr.msrb.gmra.mxu0 %v3252_v30  ;;  %v2978_v26 = vld [vmem:[#allocation5 + $0x254] sm:$0xf] }
  0xc1   :  { %1446 = vmatpush.bf16.msrb.mxu0 %v2677_v62  ;;  %v2641_v32 = vor.u32 %v2978_v26, %v2638_v27  ;;  %v2966_v62 = vld [vmem:[#allocation5 + $0x1f4] sm:$0xf]  ;;  %v2553_v26 = vor.u32 %v2956_v25, %v2550_v12 }
  0xc2   :  { %v845_v38 = vmax.f32 %v737_v34, 0.0  ;;  %v2670_v34 = vld [vmem:[#allocation5 + $0x298] sm:$0xf0]  ;;  %v2954_v27 = vld [vmem:[#allocation5 + $0x194] sm:$0xf] }
  0xc3   :  { %v2673_v39 = vor.u32 %v2986_v33, %v2670_v34  ;;  %v2534_v33 = vld [vmem:[#allocation5 + $0x188] sm:$0xf0]  ;;  %v2990_v25 = vld [vmem:[#allocation7 + $0x4] sm:$0xf] }
  0xc4   :  { %v3255_v43 = vpack.c.bf16 %v845_v38, %v845_v38  ;;  %v725_v44 = vpop.f32.mrf.mxu2 }
  0xc5   :  { %1447 = vmatpush.bf16.msrb.mxu0 %v2669_v4  ;;  %v2974_v44 = vld [vmem:[#allocation5 + $0x234] sm:$0xf]  ;;  %v2964_v4 = vld [vmem:[#allocation5 + $0x1e4] sm:$0xf] }
  0xc6   :  { %1397 = vmatmul.bf16.vlgmr.msrb.gmra.mxu1 %v3255_v43  ;;  %v2625_v47 = vor.u32 %v2974_v44, %v2622_v45  ;;  %v2744_v44 = vld [vmem:[#allocation7 + $0x78] sm:$0xf0] }
  0xc7   :  { %v738_v51 = vpop.f32.mrf.mxu3 }
  0xc8   :  { %v194_v51 = vperm.slane %v3248_v48, 4 }
  0xc9   :  { %1448 = vmatpush.bf16.msrb.mxu0 %v2661_v14  ;;  %v2574_v14 = vld [vmem:[#allocation5 + $0x1d8] sm:$0xf0] }
  0xd4   :  { %v749_v63 = vpop.f32.mrf.mxu0 }
  0xd5   :  { %v750_v2 = vadd.f32 %v749_v63, %v192_v61  ;;  %v762_v3 = vpop.f32.mrf.mxu1  ;;  %v2590_v63 = vld [vmem:[#allocation5 + $0x1f8] sm:$0xf0] }
  0xd7   :  { %v763_v5 = vadd.f32 %v762_v3, %v750_v2  ;;  %v2593_v2 = vor.u32 %v2966_v62, %v2590_v63  ;;  %v2999_v62 = vld [vmem:[#allocation7 + $0x44] sm:$0xf0]  ;;  %v2998_v63 = vld [vmem:[#allocation7 + $0x44] sm:$0xf] }
  0xd9   :  { %v846_v13 = vmax.f32 %v763_v5, 0.0  ;;  %v2582_v5 = vld [vmem:[#allocation5 + $0x1e8] sm:$0xf0] }
  0xda   :  { %v2585_v10 = vor.u32 %v2964_v4, %v2582_v5  ;;  %v2710_v4 = vld [vmem:[#allocation7 + $0x30] sm:$0xf]  ;;  %v2997_v5 = vld [vmem:[#allocation7 + $0x34] sm:$0xf0] }
  0xdb   :  { %v852_v16 = vpack.c.bf16 %v846_v13, %v846_v13  ;;  %v2962_v13 = vld [vmem:[#allocation5 + $0x1d4] sm:$0xf] }
  0xdc   :  { %v775_v11 = vpop.f32.mrf.mxu2  ;;  %v751_v21 = vpop.f32.mrf.mxu0  ;;  %v2577_v48 = vor.u32 %v2962_v13, %v2574_v14  ;;  %v2994_v13 = vld [vmem:[#allocation7 + $0x24] sm:$0xf] }
  0xdd   :  { %v776_v19 = vadd.f32 %v775_v11, %v193_v8  ;;  %v788_v20 = vpop.f32.mrf.mxu3  ;;  %1410 = vmatmul.bf16.vlgmr.msrb.gmra.mxu2 %v852_v16  ;;  %1488 = vmatmul.bf16.vlgmr.msra.gmra.mxu1 %v852_v16  ;;  %v764_v22 = vpop.f32.mrf.mxu1  ;;  %v2960_v11 = vld [vmem:[#allocation5 + $0x1c4] sm:$0xf] }
  0xde   :  { %1506 = vmatpush.bf16.msrb.mxu2 %v2657_v15  ;;  %v2958_v22 = vld [vmem:[#allocation5 + $0x1b4] sm:$0xf] }
  0xdf   :  { %v789_v23 = vadd.f32 %v788_v20, %v776_v19  ;;  %v2569_v20 = vor.u32 %v2960_v11, %v2566_v17  ;;  %v2694_v17 = vld [vmem:[#allocation7 + $0x10] sm:$0xf] }
  0xe1   :  { %v847_v28 = vmax.f32 %v789_v23, 0.0  ;;  %v2558_v23 = vld [vmem:[#allocation5 + $0x1b8] sm:$0xf0] }
  0xe2   :  { %1507 = vmatpush.bf16.msrb.mxu2 %v2649_v24  ;;  %v2561_v24 = vor.u32 %v2958_v22, %v2558_v23  ;;  %v2686_v23 = vld [vmem:[#allocation7] sm:$0xf] }
  0xe3   :  { %v3260_v31 = vpack.c.bf16 %v847_v28, %v847_v28  ;;  %v2542_v28 = vld [vmem:[#allocation5 + $0x198] sm:$0xf0] }
  0xe4   :  { %v777_v37 = vpop.f32.mrf.mxu2 }
  0xe5   :  { %1423 = vmatmul.bf16.vlgmr.msrb.gmra.mxu3 %v3260_v31  ;;  %v790_v38 = vpop.f32.mrf.mxu3 }
  0xe6   :  { %1524 = vmatpush.bf16.msrb.mxu3 %v2681_v29  ;;  %1508 = vmatpush.bf16.msrb.mxu2 %v2641_v32  ;;  %v2545_v29 = vor.u32 %v2954_v27, %v2542_v28  ;;  %v2952_v32 = vld [vmem:[#allocation5 + $0x184] sm:$0xf] }
  0xe7   :  { %v2537_v34 = vor.u32 %v2952_v32, %v2534_v33 }
  0xea   :  { %1525 = vmatpush.bf16.msrb.mxu3 %v2673_v39  ;;  %1509 = vmatpush.bf16.msrb.mxu2 %v2633_v40  ;;  %v2742_v39 = vld [vmem:[#allocation7 + $0x70] sm:$0xf]  ;;  %v3005_v40 = vld [vmem:[#allocation7 + $0x74] sm:$0xf0] }
  0xeb   :  { %v2743_v42 = vor.u32 %v3005_v40, %v2742_v39 }
  0xed   :  { %1462 = vmatmul.bf16.vlgmr.msra.gmra.mxu2 %v3252_v30  ;;  %1693 = vmatpush.bf16.msrb.mxu1 %v2743_v42  ;;  %v3009_v42 = vld [vmem:[#allocation7 + $0x94] sm:$0xf0] }
  0xee   :  { %1526 = vmatpush.bf16.msrb.mxu3 %v2665_v46  ;;  %1510 = vmatpush.bf16.msrb.mxu2 %v2625_v47  ;;  %v2747_v46 = vor.u32 %v3004_v41, %v2744_v44  ;;  %v2734_v47 = vld [vmem:[#allocation7 + $0x60] sm:$0xf]  ;;  %v2758_v41 = vld [vmem:[#allocation7 + $0x90] sm:$0xf] }
  0xef   :  { %v2750_v44 = vld [vmem:[#allocation7 + $0x80] sm:$0xf] }
  0xf2   :  { %1511 = vmatpush.bf16.msrb.mxu2 %v2617_v52 }
  0xf4   :  { %v801_v55 = vpop.f32.mrf.mxu0 }
  0xf5   :  { %v802_v56 = vadd.f32 %v801_v55, %v194_v51  ;;  %v814_v57 = vpop.f32.mrf.mxu1  ;;  %1475 = vmatmul.bf16.vlgmr.msra.gmra.mxu3 %v3255_v43  ;;  %v2736_v51 = vld [vmem:[#allocation7 + $0x68] sm:$0xf0]  ;;  %v3001_v55 = vld [vmem:[#allocation7 + $0x54] sm:$0xf0] }
  0xf6   :  { %1512 = vmatpush.bf16.msrb.mxu2 %v2609_v58  ;;  %v2739_v52 = vor.u32 %v3002_v50, %v2736_v51  ;;  %v2728_v58 = vld [vmem:[#allocation7 + $0x58] sm:$0xf0] }
  0xf7   :  { %v815_v61 = vadd.f32 %v814_v57, %v802_v56  ;;  %v3000_v56 = vld [vmem:[#allocation7 + $0x54] sm:$0xf]  ;;  %v2727_v57 = vor.u32 %v3001_v55, %v2726_v54 }
  0xf8   :  { %v2731_v60 = vor.u32 %v3000_v56, %v2728_v58  ;;  %v3008_v58 = vld [vmem:[#allocation7 + $0x94] sm:$0xf] }
  0xf9   :  { %v848_v30 = vmax.f32 %v815_v61, 0.0  ;;  %v2718_v61 = vld [vmem:[#allocation7 + $0x40] sm:$0xf] }
  0xfa   :  { %1513 = vmatpush.bf16.msrb.mxu2 %v2601_v1 }
  0xfb   :  { %v854_v3 = vpack.c.bf16 %v848_v30, %v848_v30  ;;  %v2719_v30 = vor.u32 %v2999_v62, %v2718_v61  ;;  %v3006_v62 = vld [vmem:[#allocation7 + $0x84] sm:$0xf] }
  0xfc   :  { %v803_v6 = vpop.f32.mrf.mxu0  ;;  %v827_v7 = vpop.f32.mrf.mxu2 }
  0xfd   :  { %v816_v8 = vpop.f32.mrf.mxu1  ;;  %v828_v9 = vadd.f32 %v827_v7, %v195_v0  ;;  %1436 = vmatmul.bf16.vlgmr.msra.gmra.mxu0 %v854_v3  ;;  %v840_v43 = vpop.f32.mrf.mxu3  ;;  %1514 = vmatmul.bf16.vlgmr.msrb.gmra.mxu2 %v854_v3  ;;  %v2720_v0 = vld [vmem:[#allocation7 + $0x48] sm:$0xf0]  ;;  %v2996_v6 = vld [vmem:[#allocation7 + $0x34] sm:$0xf]  ;;  %v2711_v7 = vor.u32 %v2997_v5, %v2710_v4 }
  0xfe   :  { %1493 = vmatpush.bf16.msra.mxu0 %v2593_v2  ;;  %v2723_v2 = vor.u32 %v2998_v63, %v2720_v0  ;;  %v2712_v8 = vld [vmem:[#allocation7 + $0x38] sm:$0xf0]  ;;  %v2752_v63 = vld [vmem:[#allocation7 + $0x88] sm:$0xf0] }
  0xff   :  { %v841_v15 = vadd.f32 %v840_v43, %v828_v9  ;;  %v2715_v9 = vor.u32 %v2996_v6, %v2712_v8  ;;  %v2995_v43 = vld [vmem:[#allocation7 + $0x24] sm:$0xf0] }
 0x101   :  { %v849_v16 = vmax.f32 %v841_v15, 0.0  ;;  %v2704_v15 = vld [vmem:[#allocation7 + $0x28] sm:$0xf0] }
 0x102   :  { %1494 = vmatpush.bf16.msra.mxu0 %v2585_v10  ;;  %v2702_v10 = vld [vmem:[#allocation7 + $0x20] sm:$0xf] }
 0x103   :  { %v855_v18 = vpack.c.bf16 %v849_v16, %v849_v16  ;;  %v2703_v14 = vor.u32 %v2995_v43, %v2702_v10 }
 0x104   :  { %v829_v19 = vpop.f32.mrf.mxu2 }
 0x105   :  { %v842_v21 = vpop.f32.mrf.mxu3  ;;  %2683 = vmatmul.msk.bf16.vlgmr.msrb.gmra.mxu3 %vm1372_vm0, %v855_v18  ;;  %v2992_v19 = vld [vmem:[#allocation7 + $0x14] sm:$0xf] }
 0x106   :  { %1495 = vmatpush.bf16.msra.mxu0 %v2577_v48  ;;  %v2707_v48 = vor.u32 %v2994_v13, %v2704_v15  ;;  %v2696_v21 = vld [vmem:[#allocation7 + $0x18] sm:$0xf0] }
 0x107   :  { %v2699_v22 = vor.u32 %v2992_v19, %v2696_v21 }
 0x10a   :  { %1496 = vmatpush.bf16.msra.mxu0 %v2569_v20 }
 0x10d   :  { %2682 = vmatmul.msk.bf16.vlgmr.msrb.gmra.mxu0 %vm1372_vm0, %v855_v18  ;;  %v2993_v18 = vld [vmem:[#allocation7 + $0x14] sm:$0xf0] }
 0x10e   :  { %1497 = vmatpush.bf16.msra.mxu0 %v2561_v24  ;;  %v2695_v20 = vor.u32 %v2993_v18, %v2694_v17  ;;  %v2991_v24 = vld [vmem:[#allocation7 + $0x4] sm:$0xf0] }
 0x10f   :  { %v2687_v12 = vor.u32 %v2991_v24, %v2686_v23 }
 0x112   :  { %1498 = vmatpush.bf16.msra.mxu0 %v2553_v26  ;;  %v2688_v26 = vld [vmem:[#allocation7 + $0x8] sm:$0xf0] }
 0x116   :  { %1499 = vmatpush.bf16.msra.mxu0 %v2545_v29  ;;  %v2691_v29 = vor.u32 %v2990_v25, %v2688_v26 }
 0x11a   :  { %1500 = vmatpush.bf16.msra.mxu0 %v2537_v34 }
 0x11d   :  { %1501 = vmatmul.bf16.vlgmr.msra.gmra.mxu0 %v3260_v31  ;;  %v2735_v31 = vor.u32 %v3003_v49, %v2734_v47  ;;  %v2759_v47 = vor.u32 %v3009_v42, %v2758_v41  ;;  %v3007_v49 = vld [vmem:[#allocation7 + $0x84] sm:$0xf0]  ;;  %v3013_v41 = vld [vmem:[#allocation8 + $0x18] sm:$0xff]  ;;  %v3012_v42 = vld [vmem:[#allocation8 + $0x10] sm:$0xff] }
 0x11e   :  { %1717 = vmatpush.bf16.msrb.mxu0 %v2747_v46  ;;  %v2751_v54 = vor.u32 %v3007_v49, %v2750_v44  ;;  %v3011_v44 = vld [vmem:[#allocation8 + $0x8] sm:$0xff] }
 0x11f   :  { %1694 = vmatpush.bf16.msrb.mxu1 %v2735_v31  ;;  %1711 = vmatpush.bf16.msra.mxu3 %v2759_v47 }
 0x122   :  { %1718 = vmatpush.bf16.msrb.mxu0 %v2739_v52 }
 0x123   :  { %1695 = vmatpush.bf16.msrb.mxu1 %v2727_v57  ;;  %1712 = vmatpush.bf16.msra.mxu3 %v2751_v54  ;;  %v3019_v54 = vld [vmem:[#allocation8 + $0x48] sm:$0xff] }
 0x126   :  { %1719 = vmatpush.bf16.msrb.mxu0 %v2731_v60  ;;  %v1564_v60 = vlaneseq }
 0x127   :  { %1696 = vmatpush.bf16.msrb.mxu1 %v2719_v30 }
 0x12a   :  { %1720 = vmatpush.bf16.msrb.mxu0 %v2723_v2 }
 0x12b   :  { %1697 = vmatpush.bf16.msrb.mxu1 %v2711_v7  ;;  %v1565_v7 = vshrl.u32 %v1564_v60, 7 }
 0x12d   :  { %vm1566_vm2 = vcmp.eq.s32.totalorder %v1565_v7, 0 }
 0x12e   :  { %1721 = vmatpush.bf16.msrb.mxu0 %v2715_v9 }
 0x12f   :  { %1698 = vmatpush.bf16.msrb.mxu1 %v2703_v14 }
 0x132   :  { %1722 = vmatpush.bf16.msrb.mxu0 %v2707_v48 }
 0x133   :  { %1699 = vmatpush.bf16.msrb.mxu1 %v2695_v20 }
 0x136   :  { %1723 = vmatpush.bf16.msrb.mxu0 %v2699_v22 }
 0x137   :  { %1700 = vmatpush.bf16.msrb.mxu1 %v2687_v12 }
 0x13a   :  { %1724 = vmatpush.bf16.msrb.mxu0 %v2691_v29 }
 0x13d   :  { %v3268_v35 = vpop.f32.mrf.mxu0 }
 0x143   :  { %v3270_v36 = vpop.f32.mrf.mxu1 }
 0x145   :  { %v1387_v37 = vpop.f32.mrf.mxu0 }
 0x146   :  { %v1399_v37 = vadd.f32 %v3270_v36, %v3268_v35 }
 0x14b   :  { %v1400_v38 = vpop.f32.mrf.mxu1 }
 0x15a   :  { %v3272_v45 = vpop.f32.mrf.mxu1 }
 0x160   :  { %v3274_v53 = vpop.f32.mrf.mxu2 }
 0x161   :  { %v1412_v39 = vadd.f32 %v3274_v53, %v1399_v37  ;;  %v3017_v37 = vld [vmem:[#allocation8 + $0x38] sm:$0xff] }
 0x162   :  { %v1491_v59 = vpop.f32.mrf.mxu1  ;;  %1874 = vmatpush.bf16.msra.mxu2 %v3017_v37  ;;  %1908 = vmatpush.bf16.msra.mxu1 %v3017_v37 }
 0x163   :  { %v2760_v59 = vld [vmem:[#allocation7 + $0x98] sm:$0xf0] }
 0x164   :  { %v2763_v61 = vor.u32 %v3008_v58, %v2760_v59 }
 0x166   :  { %1735 = vmatpush.bf16.msrb.mxu3 %v2763_v61 }
 0x168   :  { %v1424_v1 = vpop.f32.mrf.mxu3  ;;  %v1413_v3 = vpop.f32.mrf.mxu2 }
 0x169   :  { %v1425_v40 = vadd.f32 %v1424_v1, %v1412_v39  ;;  %v2755_v3 = vor.u32 %v3006_v62, %v2752_v63  ;;  %v3015_v39 = vld [vmem:[#allocation8 + $0x28] sm:$0xff] }
 0x16b   :  { %1736 = vmatpush.bf16.msrb.mxu3 %v2755_v3 }
 0x170   :  { %v1426_v16 = vpop.f32.mrf.mxu3  ;;  %v1463_v11 = vpop.f32.mrf.mxu2 }
 0x178   :  { %v1476_v27 = vpop.f32.mrf.mxu3  ;;  %v1465_v32 = vpop.f32.mrf.mxu2 }
 0x179   :  { %v1477_v6 = vadd.f32 %v1476_v27, %v1463_v11 }
 0x17a   :  { %v1437_v28 = vpop.f32.mrf.mxu0 }
 0x17b   :  { %v1438_v46 = vadd.f32 %v1437_v28, %v1425_v40  ;;  %v1490_v43 = vadd.f32 %v3272_v45, %v1477_v6  ;;  %v3014_v40 = vld [vmem:[#allocation8 + $0x20] sm:$0xff] }
 0x180   :  { %v1478_v33 = vpop.f32.mrf.mxu3  ;;  %v1515_v38 = vpop.f32.mrf.mxu2 }
 0x182   :  { %v1439_v34 = vpop.f32.mrf.mxu0 }
 0x188   :  { %v1528_v50 = vpop.f32.mrf.mxu3  ;;  %v1517_v52 = vpop.f32.mrf.mxu2 }
 0x18a   :  { %v1450_v31 = vpop.f32.mrf.mxu0 }
 0x18b   :  { %v3279_v51 = vadd.f32 %v1450_v31, %v1438_v46 }
 0x18d   :  { %v1533_v35 = vsel %vm1532_vm1, %v3279_v51, 0.0  ;;  %v1548_v36 = vmul.f32 %v3279_v51, %v3279_v51 }
 0x18e   :  { %v1534_v53 = vrot.slane %v1533_v35, 4 }
 0x18f   :  { %v1550_v55 = vsel %vm1532_vm1, %v1548_v36, 0.0 }
 0x190   :  { %v1535_v56 = vadd.f32 %v1534_v53, %v1533_v35  ;;  %v1551_v57 = vrot.slane %v1550_v55, 4  ;;  %v1530_v1 = vpop.f32.mrf.mxu3 }
 0x192   :  { %v1536_v30 = vrot.slane %v1535_v56, 2  ;;  %v1552_v0 = vadd.f32 %v1551_v57, %v1550_v55  ;;  %v1452_v2 = vpop.f32.mrf.mxu0  ;;  %v3018_v57 = vld [vmem:[#allocation8 + $0x40] sm:$0xff] }
 0x194   :  { %v1537_v4 = vadd.f32 %v1536_v30, %v1535_v56  ;;  %v1553_v5 = vrot.slane %v1552_v0, 2 }
 0x196   :  { %v1538_v8 = vrot.slane %v1537_v4, 1  ;;  %v1554_v9 = vadd.f32 %v1553_v5, %v1552_v0 }
 0x198   :  { %v1555_v10 = vrot.slane %v1554_v9, 1  ;;  %v1539_v14 = vadd.f32 %v1538_v8, %v1537_v4 }
 0x19a   :  { %v1502_v13 = vpop.f32.mrf.mxu0  ;;  %v1556_v15 = vadd.f32 %v1555_v10, %v1554_v9 }
 0x19b   :  { %v1503_v16 = vadd.f32 %v1502_v13, %v1490_v43 }
 0x19c   :  { %v1567_v48 = vsel %vm1566_vm2, %v1539_v14, %v1556_v15 }
 0x19d   :  { %v1516_v17 = vadd.f32 %v1515_v38, %v1503_v16  ;;  %1701 = vmatmul.f32.vlgmr.msrb.gmra.mxu1 %v1567_v48  ;;  %1725 = vmatmul.f32.vlgmr.msrb.gmra.mxu0 %v1567_v48  ;;  %v3016_v38 = vld [vmem:[#allocation8 + $0x30] sm:$0xff] }
 0x19e   :  { %1875 = vmatpush.bf16.msra.mxu2 %v3016_v38  ;;  %1909 = vmatpush.bf16.msra.mxu1 %v3016_v38 }
 0x19f   :  { %v3286_v18 = vadd.f32 %v1528_v50, %v1516_v17  ;;  %v3010_v50 = vld [vmem:[#allocation8] sm:$0xff] }
 0x1a1   :  { %v1541_v11 = vsel %vm1540_vm3, %v3286_v18, 0.0  ;;  %v1549_v19 = vmul.f32 %v3286_v18, %v3286_v18 }
 0x1a2   :  { %v1542_v20 = vrot.slane %v1541_v11, 4  ;;  %v1504_v45 = vpop.f32.mrf.mxu0  ;;  %1876 = vmatpush.bf16.msra.mxu2 %v3015_v39  ;;  %1910 = vmatpush.bf16.msra.mxu1 %v3015_v39 }
 0x1a3   :  { %v1557_v21 = vsel %vm1540_vm3, %v1549_v19, 0.0 }
 0x1a4   :  { %v1543_v22 = vadd.f32 %v1542_v20, %v1541_v11  ;;  %v1558_v23 = vrot.slane %v1557_v21, 4 }
 0x1a6   :  { %v1544_v24 = vrot.slane %v1543_v22, 2  ;;  %v1559_v25 = vadd.f32 %v1558_v23, %v1557_v21  ;;  %1877 = vmatpush.bf16.msra.mxu2 %v3014_v40  ;;  %1911 = vmatpush.bf16.msra.mxu1 %v3014_v40 }
 0x1a8   :  { %v1545_v12 = vadd.f32 %v1544_v24, %v1543_v22  ;;  %v1560_v26 = vrot.slane %v1559_v25, 2 }
 0x1aa   :  { %v1546_v27 = vrot.slane %v1545_v12, 1  ;;  %v1561_v28 = vadd.f32 %v1560_v26, %v1559_v25  ;;  %1878 = vmatpush.bf16.msra.mxu2 %v3013_v41  ;;  %1912 = vmatpush.bf16.msra.mxu1 %v3013_v41 }
 0x1ac   :  { %v1562_v29 = vrot.slane %v1561_v28, 1  ;;  %v1547_v32 = vadd.f32 %v1546_v27, %v1545_v12 }
 0x1ae   :  { %v1563_v33 = vadd.f32 %v1562_v29, %v1561_v28  ;;  %1879 = vmatpush.bf16.msra.mxu2 %v3012_v42  ;;  %1913 = vmatpush.bf16.msra.mxu1 %v3012_v42  ;;  %v1900_v28 = vld [vmem:[%s3310_s6] sm:$0x1] }
 0x1b0   :  { %v1568_v34 = vsel %vm1566_vm2, %v1547_v32, %v1563_v33 }
 0x1b1   :  { %2764 = vmatmul.msk.f32.vlgmr.msra.gmra.mxu3 %vm1689_vm4, %v1568_v34 }
 0x1b2   :  { %1880 = vmatpush.bf16.msra.mxu2 %v3011_v44  ;;  %1914 = vmatpush.bf16.msra.mxu1 %v3011_v44 }
 0x1b3   :  { %1893 = vmatpush.bf16.msra.mxu3 %v3019_v54 }
 0x1b6   :  { %1881 = vmatpush.bf16.msra.mxu2 %v3010_v50  ;;  %1915 = vmatpush.bf16.msra.mxu1 %v3010_v50 }
 0x1b7   :  { %1894 = vmatpush.bf16.msra.mxu3 %v3018_v57 }
 0x1b9   :  { %2765 = vmatmul.msk.f32.vlgmr.msrb.gmra.mxu3 %vm1689_vm4, %v1568_v34 }
 0x1bb   :  { %1927 = vmatpush.bf16.msrb.mxu3 %v3019_v54 }
 0x1bf   :  { %1928 = vmatpush.bf16.msrb.mxu3 %v3018_v57 }
 0x21a   :  { %v1702_v46 = vpop.f32.mrf.mxu1  ;;  %v1726_v36 = vpop.f32.mrf.mxu0 }
 0x234   :  { %v1714_v47 = vpop.f32.mrf.mxu3 }
 0x235   :  { %v1715_v49 = vadd.f32 %v1714_v47, %v1702_v46 }
 0x237   :  { %v1741_v31 = vmul.f32 0.025, %v1715_v49 }
 0x239   :  { %v1743_v52 = vmul.f32 %v1741_v31, %v1741_v31 }
 0x23b   :  { %v1747_v35 = vrot.slane %v1743_v52, 7 }
 0x23c   :  { %v1738_v53 = vpop.f32.mrf.mxu3 }
 0x23d   :  { %v1751_v55 = vsub.f32 %v1741_v31, %v1747_v35  ;;  %v1739_v56 = vadd.f32 %v1738_v53, %v1726_v36 }
 0x23f   :  { %v1753_v58 = vadd.f32 1e-05, %v1751_v55  ;;  %v1742_v59 = vmul.f32 0.025, %v1739_v56 }
 0x241   :  { %3031 = vrsqrt.f32 %v1753_v58  ;;  %v1744_v60 = vmul.f32 %v1742_v59, %v1742_v59  ;;  %vm1761_vm6 = vweird.f32 %v1753_v58 }
 0x243   :  { %v1748_v61 = vrot.slane %v1744_v60, 7 }
 0x245   :  { %v1752_v62 = vsub.f32 %v1742_v59, %v1748_v61 }
 0x247   :  { %v3032_v63 = vpop.eup %3031  ;;  %v1754_v30 = vadd.f32 1e-05, %v1752_v62 }
 0x248   :  { %v1756_v0 = vmul.f32 %v3032_v63, %v1753_v58  ;;  %vm1762_vm5 = vweird.f32 %v3032_v63 }
 0x249   :  { %3033 = vrsqrt.f32 %v1754_v30  ;;  %vm1763_vm7 = vmor %vm1761_vm6, %vm1762_vm5  ;;  %vm1771_vm9 = vweird.f32 %v1754_v30 }
 0x24a   :  { %v1757_v1 = vmul.f32 %v3032_v63, %v1756_v0 }
 0x24c   :  { %v1758_v2 = vmul.f32 0.5, %v1757_v1 }
 0x24e   :  { %v1759_v3 = vsub.f32 1.5, %v1758_v2 }
 0x24f   :  { %v3034_v4 = vpop.eup %3033 }
 0x250   :  { %v1760_v5 = vmul.f32 %v3032_v63, %v1759_v3  ;;  %v1766_v6 = vmul.f32 %v3034_v4, %v1754_v30  ;;  %vm1772_vm8 = vweird.f32 %v3034_v4 }
 0x251   :  { %vm1773_vm10 = vmor %vm1771_vm9, %vm1772_vm8 }
 0x252   :  { %v1764_v7 = vsel %vm1763_vm7, %v3032_v63, %v1760_v5  ;;  %v1767_v8 = vmul.f32 %v3034_v4, %v1766_v6 }
 0x253   :  { %v1775_v9 = vperm.slane %v1764_v7, 1  ;;  %v1803_v10 = vrot.slane %v1764_v7, 1 }
 0x254   :  { %v1768_v43 = vmul.f32 0.5, %v1767_v8 }
 0x255   :  { %v1807_v13 = vmul.f32 %v1803_v10, %v1741_v31  ;;  %v1777_v14 = vmul.f32 %v1775_v9, %v3279_v51 }
 0x256   :  { %v1769_v15 = vsub.f32 1.5, %v1768_v43 }
 0x257   :  { %v1809_v16 = vpack.c.bf16 %v1807_v13, %v1807_v13  ;;  %v1779_v48 = vpack.c.bf16 %v1777_v14, %v1777_v14 }
 0x258   :  { %v1770_v17 = vmul.f32 %v3034_v4, %v1769_v15 }
 0x259   :  { %1882 = vmatmul.bf16.vlgmr.msra.gmra.mxu2 %v1809_v16  ;;  %1916 = vmatmul.bf16.vlgmr.msra.gmra.mxu1 %v1779_v48 }
 0x25a   :  { %v1774_v11 = vsel %vm1773_vm10, %v3034_v4, %v1770_v17 }
 0x25b   :  { %v1804_v19 = vrot.slane %v1774_v11, 1  ;;  %v1776_v21 = vperm.slane %v1774_v11, 1 }
 0x25d   :  { %v1808_v20 = vmul.f32 %v1804_v19, %v1742_v59  ;;  %v1778_v22 = vmul.f32 %v1776_v21, %v3286_v18 }
 0x25f   :  { %v1810_v45 = vpack.c.bf16 %v1808_v20, %v1808_v20  ;;  %v1780_v23 = vpack.c.bf16 %v1778_v22, %v1778_v22 }
 0x261   :  { %2806 = vmatmul.msk.bf16.vlgmr.msra.gmra.mxu3 %vm1689_vm4, %v1810_v45 }
 0x271   :  { %2807 = vmatmul.msk.bf16.vlgmr.msrb.gmra.mxu3 %vm1689_vm4, %v1780_v23 }
 0x2d6   :  { %v1917_v51 = vpop.f32.mrf.mxu1 }
 0x2dc   :  { %v1883_v24 = vpop.f32.mrf.mxu2 }
 0x2de   :  { %v1919_v25 = vpop.f32.mrf.mxu1 }
 0x2e4   :  { %v1885_v12 = vpop.f32.mrf.mxu2  ;;  %v1896_v26 = vpop.f32.mrf.mxu3 }
 0x2e5   :  { %v1897_v27 = vadd.f32 %v1896_v26, %v1883_v24 }
 0x2e7   :  { %v1901_v29 = vsub.f32 %v1900_v28, %v1897_v27 }
 0x2e9   :  { %v1903_v33 = vperm.slane %v1901_v29, 0 }
 0x2eb   :  { %v1918_v18 = vadd.f32 %v1917_v51, %v1903_v33 }
 0x2ec   :  { %v1898_v32 = vpop.f32.mrf.mxu3 }
 0x2f4   :  { %v1930_v34 = vpop.f32.mrf.mxu3 }
 0x2f5   :  { %v1931_v37 = vadd.f32 %v1930_v34, %v1918_v18 }
 0x2f7   :  { %1934 = vst [vmem:[#allocation10] sm:$0xf] %v1931_v37 }
 0x2f8   :  { %1945 = dma.vmem_to_hbm [thread:$0]  %s1941_s28, 64, %s1943_s8, [#allocation4]  }
 0x2fc   :  { %v1932_v38 = vpop.f32.mrf.mxu3 }
 0x2fd   :  { %3161 = dma.done.wait [#allocation4], 64  }
 0x2fe   :  { %3162 = vsyncadd [#allocation4], 4294967232 }
 0x2ff   :  { %1950 = vsyncpa [#allocation3], 1 }
 0x300   :  { %1951 = vsyncpa [#allocation6], 1 }
 0x301   :  { %1952 = vsyncpa [#allocation9], 1 }
 0x302   :  { %1953 = vsyncpa [#allocation4], 1 }

</bundles_post_ra>
